<compile_context>
chip_gen: v7x
topology: tpu7x:2x2x1
jax: 0.10.0
libtpu: 0.0.40
codegen_flags: <defaults>
</compile_context>

<pallas_src>
import math
from functools import partial

import jax
import jax.numpy as jnp
from jax import lax
from jax.experimental import pallas as pl
from jax.experimental.pallas import tpu as pltpu


# ----------------------------------------------------------------------------
# helpers
# ----------------------------------------------------------------------------
def _lane_roll(t, shift):
    """Roll along the last (lane) axis, jnp.roll semantics.

    Uses the XLU rotate (pltpu.roll, free-ish slot) when the shape is
    vreg-aligned; falls back to slice+concat for tiny unaligned widths."""
    rows, width = t.shape
    s = shift % width
    if s == 0:
        return t
    if width % 128 == 0 and rows % 8 == 0:
        return pltpu.roll(t, s, axis=1)
    return jnp.concatenate([t[:, width - s:], t[:, :width - s]], axis=-1)


# ----------------------------------------------------------------------------
# Pallas kernel: grid = (batch, query-tile)
# ----------------------------------------------------------------------------
def _block_kernel(x_ref, cosq_ref, saq_ref, sbq_ref, cosk_ref, sak_ref, sbk_ref,
                  g1_ref, g2_ref,
                  wqT_ref, wkT_ref, wvT_ref, woT_ref, wgT_ref, wuT_ref, wdT_ref,
                  out_ref, k_sc, v_sc, *, nh, nkv, hd, tq, eps):
    qi = pl.program_id(1)
    n_rep = nh // nkv
    S = x_ref.shape[0]
    half = hd // 2
    scale = jnp.float32(1.0 / math.sqrt(hd))

    def rmsnorm(v, w):
        var = jnp.mean(v * v, axis=-1, keepdims=True)
        return (v * lax.rsqrt(var + eps)) * w

    def rope(t, cos_t, sa, sb):
        # t*cos + rotate_half(t)*sin on the full (rows, n_heads*hd) matrix.
        # rotate_half (per-head half swap + sign) is expressed as two full-width
        # lane rolls; the +/- sign and first/second-half select are folded into
        # the precomputed sa / sb tables (exactly one of them is nonzero per lane).
        return t * cos_t + _lane_roll(t, -half) * sa + _lane_roll(t, half) * sb

    # ---- K / V for the whole sequence: computed once per batch element ------
    @pl.when(qi == 0)
    def _():
        hf = rmsnorm(x_ref[...], g1_ref[...]).astype(jnp.bfloat16)
        k = jnp.dot(hf, wkT_ref[...], preferred_element_type=jnp.float32)
        v = jnp.dot(hf, wvT_ref[...], preferred_element_type=jnp.float32)
        k = rope(k, cosk_ref[...], sak_ref[...], sbk_ref[...])
        k_sc[...] = k.astype(jnp.bfloat16)
        v_sc[...] = v.astype(jnp.bfloat16)

    # ---- queries for this tile ----------------------------------------------
    q_start = qi * tq
    xq = x_ref[pl.ds(pl.multiple_of(q_start, tq), tq), :]            # (tq, H) f32
    hq = rmsnorm(xq, g1_ref[...]).astype(jnp.bfloat16)
    q = jnp.dot(hq, wqT_ref[...], preferred_element_type=jnp.float32)
    q = rope(q, cosq_ref[...], saq_ref[...], sbq_ref[...])
    qb = q.astype(jnp.bfloat16)
    kb = k_sc[...]
    vb = v_sc[...]

    # ---- GQA-grouped attention: one batched matmul per kv group -------------
    # group j packs its n_rep query heads along the row axis -> M = n_rep*tq.
    qg = jnp.stack(
        [jnp.concatenate([qb[:, (j * n_rep + r) * hd:(j * n_rep + r + 1) * hd]
                          for r in range(n_rep)], axis=0)
         for j in range(nkv)], axis=0)                      # (nkv, n_rep*tq, hd)
    kg = jnp.stack([kb[:, j * hd:(j + 1) * hd] for j in range(nkv)], axis=0)
    vg = jnp.stack([vb[:, j * hd:(j + 1) * hd] for j in range(nkv)], axis=0)

    s = jnp.einsum('gqd,gkd->gqk', qg, kg,
                   preferred_element_type=jnp.float32) * scale
    rows = lax.broadcasted_iota(jnp.int32, (tq, S), 0)
    cols = lax.broadcasted_iota(jnp.int32, (tq, S), 1)
    causal = jnp.tile(cols > (rows + q_start), (n_rep, 1))          # (n_rep*tq, S)
    s = jnp.where(causal[None, :, :], -jnp.inf, s)

    m = jnp.max(s, axis=-1, keepdims=True)
    p = jnp.exp(s - m)
    denom = jnp.sum(p, axis=-1, keepdims=True)
    o = jnp.einsum('gqk,gkd->gqd', p.astype(jnp.bfloat16), vg,
                   preferred_element_type=jnp.float32)
    o = o * pl.reciprocal(denom, approx=True)               # (nkv, n_rep*tq, hd)

    attn = jnp.concatenate(
        [o[j, r * tq:(r + 1) * tq, :] for j in range(nkv) for r in range(n_rep)],
        axis=-1)                                                        # (tq, H)
    attn = jnp.dot(attn.astype(jnp.bfloat16), woT_ref[...],
                   preferred_element_type=jnp.float32)
    x1 = xq + attn

    # ---- post-attention norm + SwiGLU FFN + residual -------------------------
    h2 = rmsnorm(x1, g2_ref[...]).astype(jnp.bfloat16)
    g = jnp.dot(h2, wgT_ref[...], preferred_element_type=jnp.float32)
    u = jnp.dot(h2, wuT_ref[...], preferred_element_type=jnp.float32)
    a = ((g * lax.logistic(g)) * u).astype(jnp.bfloat16)               # SiLU gate
    ff = jnp.dot(a, wdT_ref[...], preferred_element_type=jnp.float32)
    out_ref[...] = (x1 + ff).astype(out_ref.dtype)


# ----------------------------------------------------------------------------
# Wrapper: layout plumbing + pallas_call
# ----------------------------------------------------------------------------
def _pick_q_tile(S):
    for cand in (512, 256, 128, 64, 32, 16, 8):
        if S % cand == 0:
            return cand
    return S


def minimind_block_pallas(x, params, cos, sin, *, num_heads, num_kv_heads,
                          eps=1e-5, q_tile=None):
    B, S, H = x.shape
    hd = H // num_heads
    kvd = num_kv_heads * hd
    inter = params["w_gate"].shape[0]

    tq = q_tile if q_tile is not None else _pick_q_tile(S)
    assert S % tq == 0
    n_qt = S // tq

    f32, bf16 = jnp.float32, jnp.bfloat16

    # nn.Linear weights (out,in) -> (in,out), cast to bf16 for DMA + MXU.
    wqT = params["w_q"].T.astype(bf16)
    wkT = params["w_k"].T.astype(bf16)
    wvT = params["w_v"].T.astype(bf16)
    woT = params["w_o"].T.astype(bf16)
    wgT = params["w_gate"].T.astype(bf16)
    wuT = params["w_up"].T.astype(bf16)
    wdT = params["w_down"].T.astype(bf16)
    g1 = params["ln1"].reshape(1, H).astype(f32)
    g2 = params["ln2"].reshape(1, H).astype(f32)

    # RoPE tables pre-tiled across heads; rotate-half sign/select folded into
    # sa (coeff of lane-roll(t, -hd/2)) and sb (coeff of lane-roll(t, +hd/2)).
    def rope_tables(n):
        c = jnp.tile(cos.astype(f32), (1, n))                 # (S, n*hd)
        s = jnp.tile(sin.astype(f32), (1, n))
        first = ((jnp.arange(n * hd) % hd) < (hd // 2))[None, :]
        sa = jnp.where(first, -s, 0.0).astype(f32)
        sb = jnp.where(first, 0.0, s).astype(f32)
        return c, sa, sb

    cos_q, sa_q, sb_q = rope_tables(num_heads)
    cos_k, sa_k, sb_k = rope_tables(num_kv_heads)

    kernel = partial(_block_kernel, nh=num_heads, nkv=num_kv_heads, hd=hd,
                     tq=tq, eps=eps)

    # Rough VMEM working-set estimate -> explicit scoped-vmem limit.
    est = (2 * (2 * H * H + 2 * H * kvd + 3 * H * inter)       # bf16 weights
           + 4 * 3 * (S * kvd + 2 * tq * H)                    # rope tables
           + 4 * 2 * (S * H + tq * H)                          # x / out (2 bufs)
           + 2 * 2 * S * kvd                                   # k/v scratch
           + 4 * (3 * num_heads * tq * S + 4 * tq * inter + 4 * S * H + 8 * tq * H))
    vmem_limit = int(min(max(2 * est, 32 * 1024 * 1024), 100 * 1024 * 1024))

    def run(single_buffer_weights):
        pm = pl.Buffered(1) if single_buffer_weights else None

        def const_spec(shape):            # grid-invariant operand
            nd = len(shape)
            return pl.BlockSpec(shape, lambda b, qi: (0,) * nd, pipeline_mode=pm)

        qrope_spec = pl.BlockSpec((tq, H), lambda b, qi: (qi, 0))

        out = pl.pallas_call(
            kernel,
            out_shape=jax.ShapeDtypeStruct((B, S, H), x.dtype),
            grid_spec=pltpu.PrefetchScalarGridSpec(
                num_scalar_prefetch=0,
                grid=(B, n_qt),
                in_specs=[
                    pl.BlockSpec((pl.Squeezed(), S, H), lambda b, qi: (b, 0, 0)),
                    qrope_spec, qrope_spec, qrope_spec,
                    const_spec((S, kvd)), const_spec((S, kvd)), const_spec((S, kvd)),
                    const_spec((1, H)), const_spec((1, H)),
                    const_spec((H, H)), const_spec((H, kvd)), const_spec((H, kvd)),
                    const_spec((H, H)),
                    const_spec((H, inter)), const_spec((H, inter)),
                    const_spec((inter, H)),
                ],
                out_specs=pl.BlockSpec((pl.Squeezed(), tq, H),
                                       lambda b, qi: (b, qi, 0)),
                scratch_shapes=[pltpu.VMEM((S, kvd), bf16),     # rope'd K (bf16)
                                pltpu.VMEM((S, kvd), bf16)],    # V (bf16)
            ),
            compiler_params=pltpu.CompilerParams(
                dimension_semantics=("parallel", "arbitrary"),
                vmem_limit_bytes=vmem_limit),
        )(x, cos_q, sa_q, sb_q, cos_k, sa_k, sb_k, g1, g2,
          wqT, wkT, wvT, woT, wgT, wuT, wdT)
        return jax.block_until_ready(out)

    try:
        return run(True)
    except Exception:
        # TODO(synk): pl.Buffered(1) (single-buffered invariant weights) not
        # supported on this jax build; fall back to default double buffering.
        return run(False)


# ----------------------------------------------------------------------------
# Pure-JAX reference (mirrors the PyTorch forward). mirror_bf16=True replays the
# kernel's numerical recipe (bf16 matmul operands, f32 accumulation) so the
# comparison isolates kernel bugs from expected bf16 rounding.
# ----------------------------------------------------------------------------
def minimind_block_ref(x, params, cos, sin, *, num_heads, num_kv_heads,
                       eps=1e-5, mirror_bf16=True):
    B, S, H = x.shape
    hd = H // num_heads
    n_rep = num_heads // num_kv_heads

    if mirror_bf16:
        cast = lambda t: t.astype(jnp.bfloat16)
        ekw = dict(preferred_element_type=jnp.float32)
    else:
        cast = lambda t: t
        ekw = dict(preferred_element_type=jnp.float32,
                   precision=lax.Precision.HIGHEST)

    def mm(a, w):
        return jnp.matmul(cast(a), cast(w.T), **ekw)

    def rmsnorm(v, w):
        var = jnp.mean(v * v, axis=-1, keepdims=True)
        return (v * lax.rsqrt(var + eps)) * w

    h = rmsnorm(x, params["ln1"])
    q = mm(h, params["w_q"]).reshape(B, S, num_heads, hd)
    k = mm(h, params["w_k"]).reshape(B, S, num_kv_heads, hd)
    v = mm(h, params["w_v"]).reshape(B, S, num_kv_heads, hd)

    def rot_half(t):
        return jnp.concatenate([-t[..., hd // 2:], t[..., :hd // 2]], axis=-1)

    c = cos[None, :, None, :]
    s = sin[None, :, None, :]
    q = q * c + rot_half(q) * s
    k = k * c + rot_half(k) * s

    k = jnp.repeat(k, n_rep, axis=2)
    v = jnp.repeat(v, n_rep, axis=2)
    q, k, v = (t.transpose(0, 2, 1, 3) for t in (q, k, v))    # (B, nh, S, hd)

    scores = jnp.einsum("bhqd,bhkd->bhqk", cast(q), cast(k), **ekw)
    scores = scores * (1.0 / math.sqrt(hd))
    row = lax.broadcasted_iota(jnp.int32, (S, S), 0)
    col = lax.broadcasted_iota(jnp.int32, (S, S), 1)
    scores = jnp.where((col > row)[None, None], -jnp.inf, scores)
    m = jnp.max(scores, axis=-1, keepdims=True)
    p = jnp.exp(scores - m)
    denom = jnp.sum(p, axis=-1, keepdims=True)
    o = jnp.einsum("bhqk,bhkd->bhqd", cast(p), cast(v), **ekw) / denom
    o = o.transpose(0, 2, 1, 3).reshape(B, S, H)
    x1 = x + mm(o, params["w_o"])

    h2 = rmsnorm(x1, params["ln2"])
    g = mm(h2, params["w_gate"])
    u = mm(h2, params["w_up"])
    ff = mm(g * lax.logistic(g) * u, params["w_down"])
    return x1 + ff


# ----------------------------------------------------------------------------
if __name__ == "__main__":
    def make_inputs(key, B, S, H, NH, NKV, theta=1e6):
        HD = H // NH
        I = 64 * ((int(H * 8 / 3) + 63) // 64)
        ks = jax.random.split(key, 9)
        init = lambda k, shp: jax.random.normal(k, shp, jnp.float32) * 0.02
        params = {
            "ln1": jnp.ones((H,), jnp.float32)
                   + 0.1 * jax.random.normal(ks[7], (H,), jnp.float32),
            "ln2": jnp.ones((H,), jnp.float32),
            "w_q": init(ks[0], (NH * HD, H)),
            "w_k": init(ks[1], (NKV * HD, H)),
            "w_v": init(ks[2], (NKV * HD, H)),
            "w_o": init(ks[3], (H, NH * HD)),
            "w_gate": init(ks[4], (I, H)),
            "w_up": init(ks[5], (I, H)),
            "w_down": init(ks[6], (H, I)),
        }
        inv_freq = 1.0 / (theta ** (jnp.arange(0, HD, 2, dtype=jnp.float32) / HD))
        t = jnp.arange(S, dtype=jnp.float32)
        freqs = jnp.outer(t, inv_freq)
        emb = jnp.concatenate([freqs, freqs], axis=-1)         # (S, HD)
        x = jax.random.normal(ks[8], (B, S, H), jnp.float32)
        return x, params, jnp.cos(emb), jnp.sin(emb)

    key = jax.random.PRNGKey(0)
    H, NH, NKV, EPS = 32, 4, 2, 1e-5

    # case 1: single query tile; case 2: S=32 with tq=8 -> exercises the
    # 4-step query-tile pipeline and the once-per-batch K/V scratch path.
    for (B, S, q_tile) in [(2, 8, None), (2, 32, 8)]:
        x, params, cos, sin = make_inputs(jax.random.fold_in(key, S),
                                          B, S, H, NH, NKV)
        out = minimind_block_pallas(x, params, cos, sin, num_heads=NH,
                                    num_kv_heads=NKV, eps=EPS, q_tile=q_tile)
        out = jax.block_until_ready(out)
        assert out.shape == (B, S, H)

        ref_bf = minimind_block_ref(x, params, cos, sin, num_heads=NH,
                                    num_kv_heads=NKV, eps=EPS, mirror_bf16=True)
        ref_f32 = minimind_block_ref(x, params, cos, sin, num_heads=NH,
                                     num_kv_heads=NKV, eps=EPS, mirror_bf16=False)
        err_bf = float(jnp.max(jnp.abs(out - ref_bf)))
        err_f32 = float(jnp.max(jnp.abs(out - ref_f32)))
        assert jnp.allclose(out, ref_bf, rtol=2e-3, atol=2e-3), (S, err_bf)
        assert jnp.allclose(out, ref_f32, rtol=2e-2, atol=2e-2), (S, err_f32)

    # TODO(synk): use_cache / past_key_value (KV-cache concat), attention_mask
    # and the MoE FFN path are not exposed; this kernel implements the default
    # inference forward (use_cache=False, attention_mask=None, dropout=0).
    print("KERNEL_OK")
</pallas_src>

<mosaic_0001>
module attributes {stable_mosaic.version = 11 : i64} {
  func.func @_block_kernel(%arg0: i32, %arg1: i32, %arg2: memref<1x8x32xf32, #tpu.memory_space<vmem>>, %arg3: memref<8x32xf32, #tpu.memory_space<vmem>>, %arg4: memref<8x32xf32, #tpu.memory_space<vmem>>, %arg5: memref<8x32xf32, #tpu.memory_space<vmem>>, %arg6: memref<8x16xf32, #tpu.memory_space<vmem>>, %arg7: memref<8x16xf32, #tpu.memory_space<vmem>>, %arg8: memref<8x16xf32, #tpu.memory_space<vmem>>, %arg9: memref<1x32xf32, #tpu.memory_space<vmem>>, %arg10: memref<1x32xf32, #tpu.memory_space<vmem>>, %arg11: memref<32x32xbf16, #tpu.memory_space<vmem>>, %arg12: memref<32x16xbf16, #tpu.memory_space<vmem>>, %arg13: memref<32x16xbf16, #tpu.memory_space<vmem>>, %arg14: memref<32x32xbf16, #tpu.memory_space<vmem>>, %arg15: memref<32x128xbf16, #tpu.memory_space<vmem>>, %arg16: memref<32x128xbf16, #tpu.memory_space<vmem>>, %arg17: memref<128x32xbf16, #tpu.memory_space<vmem>>, %arg18: memref<1x8x32xf32, #tpu.memory_space<vmem>>, %arg19: memref<8x16xbf16, #tpu.memory_space<vmem>>, %arg20: memref<8x16xbf16, #tpu.memory_space<vmem>>) attributes {dimension_semantics = [#tpu.dimension_semantics<parallel>, #tpu.dimension_semantics<arbitrary>], iteration_bounds = array<i64: 2, 1>, scalar_prefetch = 0 : i64, scratch_operands = 2 : i64, tpu.core_type = #tpu.core_type<tc>, window_params = [{transform_indices = @transform_0, window_bounds = array<i64: 1, 8, 32>}, {transform_indices = @transform_1, window_bounds = array<i64: 8, 32>}, {transform_indices = @transform_2, window_bounds = array<i64: 8, 32>}, {transform_indices = @transform_3, window_bounds = array<i64: 8, 32>}, {pipeline_mode = #tpu.pipeline_mode<synchronous>, transform_indices = @transform_4, window_bounds = array<i64: 8, 16>}, {pipeline_mode = #tpu.pipeline_mode<synchronous>, transform_indices = @transform_5, window_bounds = array<i64: 8, 16>}, {pipeline_mode = #tpu.pipeline_mode<synchronous>, transform_indices = @transform_6, window_bounds = array<i64: 8, 16>}, {pipeline_mode = #tpu.pipeline_mode<synchronous>, transform_indices = @transform_7, window_bounds = array<i64: 1, 32>}, {pipeline_mode = #tpu.pipeline_mode<synchronous>, transform_indices = @transform_8, window_bounds = array<i64: 1, 32>}, {pipeline_mode = #tpu.pipeline_mode<synchronous>, transform_indices = @transform_9, window_bounds = array<i64: 32, 32>}, {pipeline_mode = #tpu.pipeline_mode<synchronous>, transform_indices = @transform_10, window_bounds = array<i64: 32, 16>}, {pipeline_mode = #tpu.pipeline_mode<synchronous>, transform_indices = @transform_11, window_bounds = array<i64: 32, 16>}, {pipeline_mode = #tpu.pipeline_mode<synchronous>, transform_indices = @transform_12, window_bounds = array<i64: 32, 32>}, {pipeline_mode = #tpu.pipeline_mode<synchronous>, transform_indices = @transform_13, window_bounds = array<i64: 32, 128>}, {pipeline_mode = #tpu.pipeline_mode<synchronous>, transform_indices = @transform_14, window_bounds = array<i64: 32, 128>}, {pipeline_mode = #tpu.pipeline_mode<synchronous>, transform_indices = @transform_15, window_bounds = array<i64: 128, 32>}, {transform_indices = @transform_16, window_bounds = array<i64: 1, 8, 32>}]} {
    %c0_i32 = arith.constant 0 : i32
    %0 = arith.cmpi eq, %arg1, %c0_i32 : i32
    %1 = arith.extui %0 : i1 to i32
    %c0_i32_0 = arith.constant 0 : i32
    %2 = arith.cmpi ne, %1, %c0_i32_0 : i32
    scf.if %2 {
      %c0_46 = arith.constant 0 : index
      %c0_47 = arith.constant 0 : index
      %c0_48 = arith.constant 0 : index
      %131 = vector.load %arg2[%c0_46, %c0_47, %c0_48] : memref<1x8x32xf32, #tpu.memory_space<vmem>>, vector<1x8x32xf32>
      %132 = vector.shape_cast %131 : vector<1x8x32xf32> to vector<8x32xf32>
      %c0_49 = arith.constant 0 : index
      %c0_50 = arith.constant 0 : index
      %133 = vector.load %arg9[%c0_49, %c0_50] : memref<1x32xf32, #tpu.memory_space<vmem>>, vector<1x32xf32>
      %134 = arith.mulf %132, %132 : vector<8x32xf32>
      %cst_51 = arith.constant dense<0.000000e+00> : vector<8xf32>
      %135 = vector.multi_reduction <add>, %134, %cst_51 [1] : vector<8x32xf32> to vector<8xf32>
      %136 = vector.shape_cast %135 : vector<8xf32> to vector<8x1xf32>
      %cst_52 = arith.constant 3.200000e+01 : f32
      %137 = vector.broadcast %cst_52 : f32 to vector<8x1xf32>
      %138 = arith.divf %136, %137 : vector<8x1xf32>
      %cst_53 = arith.constant 9.99999974E-6 : f32
      %139 = vector.broadcast %cst_53 : f32 to vector<8x1xf32>
      %140 = arith.addf %138, %139 : vector<8x1xf32>
      %141 = math.rsqrt %140 : vector<8x1xf32>
      %142 = vector.broadcast %141 : vector<8x1xf32> to vector<8x32xf32>
      %143 = arith.mulf %132, %142 : vector<8x32xf32>
      %144 = vector.broadcast %133 : vector<1x32xf32> to vector<8x32xf32>
      %145 = arith.mulf %143, %144 : vector<8x32xf32>
      %146 = arith.truncf %145 : vector<8x32xf32> to vector<8x32xbf16>
      %c0_54 = arith.constant 0 : index
      %c0_55 = arith.constant 0 : index
      %147 = vector.load %arg12[%c0_54, %c0_55] : memref<32x16xbf16, #tpu.memory_space<vmem>>, vector<32x16xbf16>
      %cst_56 = arith.constant dense<0.000000e+00> : vector<8x16xf32>
      %148 = tpu.matmul %146, %147, %cst_56 {dimension_numbers = #tpu.dot_dimension_numbers<[1], [0], [0], [1], [0, 0, 1, 1], [], []>} : vector<8x32xbf16>, vector<32x16xbf16>, vector<8x16xf32> -> vector<8x16xf32>
      %c0_57 = arith.constant 0 : index
      %c0_58 = arith.constant 0 : index
      %149 = vector.load %arg13[%c0_57, %c0_58] : memref<32x16xbf16, #tpu.memory_space<vmem>>, vector<32x16xbf16>
      %cst_59 = arith.constant dense<0.000000e+00> : vector<8x16xf32>
      %150 = tpu.matmul %146, %149, %cst_59 {dimension_numbers = #tpu.dot_dimension_numbers<[1], [0], [0], [1], [0, 0, 1, 1], [], []>} : vector<8x32xbf16>, vector<32x16xbf16>, vector<8x16xf32> -> vector<8x16xf32>
      %c0_60 = arith.constant 0 : index
      %c0_61 = arith.constant 0 : index
      %151 = vector.load %arg6[%c0_60, %c0_61] : memref<8x16xf32, #tpu.memory_space<vmem>>, vector<8x16xf32>
      %c0_62 = arith.constant 0 : index
      %c0_63 = arith.constant 0 : index
      %152 = vector.load %arg7[%c0_62, %c0_63] : memref<8x16xf32, #tpu.memory_space<vmem>>, vector<8x16xf32>
      %c0_64 = arith.constant 0 : index
      %c0_65 = arith.constant 0 : index
      %153 = vector.load %arg8[%c0_64, %c0_65] : memref<8x16xf32, #tpu.memory_space<vmem>>, vector<8x16xf32>
      %154 = arith.mulf %148, %151 : vector<8x16xf32>
      %155 = vector.extract_strided_slice %148 {offsets = [0, 4], sizes = [8, 12], strides = [1, 1]} : vector<8x16xf32> to vector<8x12xf32>
      %156 = vector.extract_strided_slice %148 {offsets = [0, 0], sizes = [8, 4], strides = [1, 1]} : vector<8x16xf32> to vector<8x4xf32>
      %157 = tpu.concatenate %155, %156 in 1 : vector<8x12xf32>, vector<8x4xf32> -> vector<8x16xf32>
      %158 = arith.mulf %157, %152 : vector<8x16xf32>
      %159 = arith.addf %154, %158 : vector<8x16xf32>
      %160 = vector.extract_strided_slice %148 {offsets = [0, 12], sizes = [8, 4], strides = [1, 1]} : vector<8x16xf32> to vector<8x4xf32>
      %161 = vector.extract_strided_slice %148 {offsets = [0, 0], sizes = [8, 12], strides = [1, 1]} : vector<8x16xf32> to vector<8x12xf32>
      %162 = tpu.concatenate %160, %161 in 1 : vector<8x4xf32>, vector<8x12xf32> -> vector<8x16xf32>
      %163 = arith.mulf %162, %153 : vector<8x16xf32>
      %164 = arith.addf %159, %163 : vector<8x16xf32>
      %165 = arith.truncf %164 : vector<8x16xf32> to vector<8x16xbf16>
      %c0_66 = arith.constant 0 : index
      %c0_67 = arith.constant 0 : index
      %166 = vector.load %arg19[%c0_66, %c0_67] : memref<8x16xbf16, #tpu.memory_space<vmem>>, vector<8x16xbf16>
      tpu.vector_store %arg19[%c0_66, %c0_67], %165 {strides = array<i32>} : memref<8x16xbf16, #tpu.memory_space<vmem>>, vector<8x16xbf16>,
      %167 = arith.truncf %150 : vector<8x16xf32> to vector<8x16xbf16>
      %c0_68 = arith.constant 0 : index
      %c0_69 = arith.constant 0 : index
      %168 = vector.load %arg20[%c0_68, %c0_69] : memref<8x16xbf16, #tpu.memory_space<vmem>>, vector<8x16xbf16>
      tpu.vector_store %arg20[%c0_68, %c0_69], %167 {strides = array<i32>} : memref<8x16xbf16, #tpu.memory_space<vmem>>, vector<8x16xbf16>,
    } else {
    }
    %c8_i32 = arith.constant 8 : i32
    %3 = arith.muli %arg1, %c8_i32 : i32
    %4 = tpu.assume_multiple %3, 8 : i32
    %c0 = arith.constant 0 : index
    %5 = arith.index_cast %4 : i32 to index
    %c0_1 = arith.constant 0 : index
    %6 = vector.load %arg2[%c0, %5, %c0_1] : memref<1x8x32xf32, #tpu.memory_space<vmem>>, vector<1x8x32xf32>
    %7 = vector.shape_cast %6 : vector<1x8x32xf32> to vector<8x32xf32>
    %c0_2 = arith.constant 0 : index
    %c0_3 = arith.constant 0 : index
    %8 = vector.load %arg9[%c0_2, %c0_3] : memref<1x32xf32, #tpu.memory_space<vmem>>, vector<1x32xf32>
    %9 = arith.mulf %7, %7 : vector<8x32xf32>
    %cst = arith.constant dense<0.000000e+00> : vector<8xf32>
    %10 = vector.multi_reduction <add>, %9, %cst [1] : vector<8x32xf32> to vector<8xf32>
    %11 = vector.shape_cast %10 : vector<8xf32> to vector<8x1xf32>
    %cst_4 = arith.constant 3.200000e+01 : f32
    %12 = vector.broadcast %cst_4 : f32 to vector<8x1xf32>
    %13 = arith.divf %11, %12 : vector<8x1xf32>
    %cst_5 = arith.constant 9.99999974E-6 : f32
    %14 = vector.broadcast %cst_5 : f32 to vector<8x1xf32>
    %15 = arith.addf %13, %14 : vector<8x1xf32>
    %16 = math.rsqrt %15 : vector<8x1xf32>
    %17 = vector.broadcast %16 : vector<8x1xf32> to vector<8x32xf32>
    %18 = arith.mulf %7, %17 : vector<8x32xf32>
    %19 = vector.broadcast %8 : vector<1x32xf32> to vector<8x32xf32>
    %20 = arith.mulf %18, %19 : vector<8x32xf32>
    %21 = arith.truncf %20 : vector<8x32xf32> to vector<8x32xbf16>
    %c0_6 = arith.constant 0 : index
    %c0_7 = arith.constant 0 : index
    %22 = vector.load %arg11[%c0_6, %c0_7] : memref<32x32xbf16, #tpu.memory_space<vmem>>, vector<32x32xbf16>
    %cst_8 = arith.constant dense<0.000000e+00> : vector<8x32xf32>
    %23 = tpu.matmul %21, %22, %cst_8 {dimension_numbers = #tpu.dot_dimension_numbers<[1], [0], [0], [1], [0, 0, 1, 1], [], []>} : vector<8x32xbf16>, vector<32x32xbf16>, vector<8x32xf32> -> vector<8x32xf32>
    %c0_9 = arith.constant 0 : index
    %c0_10 = arith.constant 0 : index
    %24 = vector.load %arg3[%c0_9, %c0_10] : memref<8x32xf32, #tpu.memory_space<vmem>>, vector<8x32xf32>
    %c0_11 = arith.constant 0 : index
    %c0_12 = arith.constant 0 : index
    %25 = vector.load %arg4[%c0_11, %c0_12] : memref<8x32xf32, #tpu.memory_space<vmem>>, vector<8x32xf32>
    %c0_13 = arith.constant 0 : index
    %c0_14 = arith.constant 0 : index
    %26 = vector.load %arg5[%c0_13, %c0_14] : memref<8x32xf32, #tpu.memory_space<vmem>>, vector<8x32xf32>
    %27 = arith.mulf %23, %24 : vector<8x32xf32>
    %28 = vector.extract_strided_slice %23 {offsets = [0, 4], sizes = [8, 28], strides = [1, 1]} : vector<8x32xf32> to vector<8x28xf32>
    %29 = vector.extract_strided_slice %23 {offsets = [0, 0], sizes = [8, 4], strides = [1, 1]} : vector<8x32xf32> to vector<8x4xf32>
    %30 = tpu.concatenate %28, %29 in 1 : vector<8x28xf32>, vector<8x4xf32> -> vector<8x32xf32>
    %31 = arith.mulf %30, %25 : vector<8x32xf32>
    %32 = arith.addf %27, %31 : vector<8x32xf32>
    %33 = vector.extract_strided_slice %23 {offsets = [0, 28], sizes = [8, 4], strides = [1, 1]} : vector<8x32xf32> to vector<8x4xf32>
    %34 = vector.extract_strided_slice %23 {offsets = [0, 0], sizes = [8, 28], strides = [1, 1]} : vector<8x32xf32> to vector<8x28xf32>
    %35 = tpu.concatenate %33, %34 in 1 : vector<8x4xf32>, vector<8x28xf32> -> vector<8x32xf32>
    %36 = arith.mulf %35, %26 : vector<8x32xf32>
    %37 = arith.addf %32, %36 : vector<8x32xf32>
    %38 = arith.truncf %37 : vector<8x32xf32> to vector<8x32xbf16>
    %c0_15 = arith.constant 0 : index
    %c0_16 = arith.constant 0 : index
    %39 = vector.load %arg19[%c0_15, %c0_16] : memref<8x16xbf16, #tpu.memory_space<vmem>>, vector<8x16xbf16>
    %c0_17 = arith.constant 0 : index
    %c0_18 = arith.constant 0 : index
    %40 = vector.load %arg20[%c0_17, %c0_18] : memref<8x16xbf16, #tpu.memory_space<vmem>>, vector<8x16xbf16>
    %41 = vector.extract_strided_slice %38 {offsets = [0, 0], sizes = [8, 8], strides = [1, 1]} : vector<8x32xbf16> to vector<8x8xbf16>
    %42 = vector.extract_strided_slice %38 {offsets = [0, 8], sizes = [8, 8], strides = [1, 1]} : vector<8x32xbf16> to vector<8x8xbf16>
    %43 = tpu.concatenate %41, %42 in 0 : vector<8x8xbf16>, vector<8x8xbf16> -> vector<16x8xbf16>
    %44 = vector.extract_strided_slice %38 {offsets = [0, 16], sizes = [8, 8], strides = [1, 1]} : vector<8x32xbf16> to vector<8x8xbf16>
    %45 = vector.extract_strided_slice %38 {offsets = [0, 24], sizes = [8, 8], strides = [1, 1]} : vector<8x32xbf16> to vector<8x8xbf16>
    %46 = tpu.concatenate %44, %45 in 0 : vector<8x8xbf16>, vector<8x8xbf16> -> vector<16x8xbf16>
    %47 = vector.shape_cast %43 : vector<16x8xbf16> to vector<1x16x8xbf16>
    %48 = vector.shape_cast %46 : vector<16x8xbf16> to vector<1x16x8xbf16>
    %49 = tpu.concatenate %47, %48 in 0 : vector<1x16x8xbf16>, vector<1x16x8xbf16> -> vector<2x16x8xbf16>
    %50 = vector.extract_strided_slice %39 {offsets = [0, 0], sizes = [8, 8], strides = [1, 1]} : vector<8x16xbf16> to vector<8x8xbf16>
    %51 = vector.extract_strided_slice %39 {offsets = [0, 8], sizes = [8, 8], strides = [1, 1]} : vector<8x16xbf16> to vector<8x8xbf16>
    %52 = vector.shape_cast %50 : vector<8x8xbf16> to vector<1x8x8xbf16>
    %53 = vector.shape_cast %51 : vector<8x8xbf16> to vector<1x8x8xbf16>
    %54 = tpu.concatenate %52, %53 in 0 : vector<1x8x8xbf16>, vector<1x8x8xbf16> -> vector<2x8x8xbf16>
    %55 = vector.extract_strided_slice %40 {offsets = [0, 0], sizes = [8, 8], strides = [1, 1]} : vector<8x16xbf16> to vector<8x8xbf16>
    %56 = vector.extract_strided_slice %40 {offsets = [0, 8], sizes = [8, 8], strides = [1, 1]} : vector<8x16xbf16> to vector<8x8xbf16>
    %57 = vector.shape_cast %55 : vector<8x8xbf16> to vector<1x8x8xbf16>
    %58 = vector.shape_cast %56 : vector<8x8xbf16> to vector<1x8x8xbf16>
    %59 = tpu.concatenate %57, %58 in 0 : vector<1x8x8xbf16>, vector<1x8x8xbf16> -> vector<2x8x8xbf16>
    "tpu.trace_start"() <{level = 10 : i32, message = "gqd,gkd->gqk"}> : () -> ()
    %cst_19 = arith.constant dense<0.000000e+00> : vector<2x16x8xf32>
    %60 = tpu.matmul %49, %54, %cst_19 {dimension_numbers = #tpu.dot_dimension_numbers<[2], [2], [1], [1], [0, 0, 0, 1, 1, 1], [0], [0]>} : vector<2x16x8xbf16>, vector<2x8x8xbf16>, vector<2x16x8xf32> -> vector<2x16x8xf32>
    "tpu.trace_stop"() : () -> ()
    %cst_20 = arith.constant 0.353553385 : f32
    %61 = vector.broadcast %cst_20 : f32 to vector<2x16x8xf32>
    %62 = arith.mulf %60, %61 : vector<2x16x8xf32>
    %63 = tpu.iota {dimensions = array<i32: 0>} : vector<8x8xi32>
    %64 = tpu.iota {dimensions = array<i32: 1>} : vector<8x8xi32>
    %65 = vector.broadcast %3 : i32 to vector<8x8xi32>
    %66 = arith.addi %63, %65 : vector<8x8xi32>
    %67 = arith.cmpi sgt, %64, %66 : vector<8x8xi32>
    %68 = tpu.concatenate %67, %67 in 0 : vector<8x8xi1>, vector<8x8xi1> -> vector<16x8xi1>
    %69 = vector.shape_cast %68 : vector<16x8xi1> to vector<1x16x8xi1>
    %cst_21 = arith.constant 0xFF800000 : f32
    %70 = vector.shape_cast %69 : vector<1x16x8xi1> to vector<1x16x8xi1>
    %71 = vector.broadcast %70 : vector<1x16x8xi1> to vector<2x16x8xi1>
    %72 = vector.broadcast %cst_21 : f32 to vector<2x16x8xf32>
    %73 = arith.select %71, %72, %62 : vector<2x16x8xi1>, vector<2x16x8xf32>
    %cst_22 = arith.constant dense<0xFF800000> : vector<2x16xf32>
    %74 = vector.multi_reduction <maximumf>, %73, %cst_22 [2] : vector<2x16x8xf32> to vector<2x16xf32>
    %75 = vector.shape_cast %74 : vector<2x16xf32> to vector<2x16x1xf32>
    %76 = vector.broadcast %75 : vector<2x16x1xf32> to vector<2x16x8xf32>
    %77 = arith.subf %73, %76 : vector<2x16x8xf32>
    %78 = math.exp %77 : vector<2x16x8xf32>
    %cst_23 = arith.constant dense<0.000000e+00> : vector<2x16xf32>
    %79 = vector.multi_reduction <add>, %78, %cst_23 [2] : vector<2x16x8xf32> to vector<2x16xf32>
    %80 = vector.shape_cast %79 : vector<2x16xf32> to vector<2x16x1xf32>
    %81 = arith.truncf %78 : vector<2x16x8xf32> to vector<2x16x8xbf16>
    "tpu.trace_start"() <{level = 10 : i32, message = "gqk,gkd->gqd"}> : () -> ()
    %cst_24 = arith.constant dense<0.000000e+00> : vector<2x16x8xf32>
    %82 = tpu.matmul %81, %59, %cst_24 {dimension_numbers = #tpu.dot_dimension_numbers<[2], [1], [1], [2], [0, 0, 0, 1, 1, 2], [0], [0]>} : vector<2x16x8xbf16>, vector<2x8x8xbf16>, vector<2x16x8xf32> -> vector<2x16x8xf32>
    "tpu.trace_stop"() : () -> ()
    %83 = tpu.reciprocal %80 {approx = true} : vector<2x16x1xf32> -> vector<2x16x1xf32>
    %84 = vector.broadcast %83 : vector<2x16x1xf32> to vector<2x16x8xf32>
    %85 = arith.mulf %82, %84 : vector<2x16x8xf32>
    %86 = vector.extract_strided_slice %85 {offsets = [0, 0, 0], sizes = [1, 8, 8], strides = [1, 1, 1]} : vector<2x16x8xf32> to vector<1x8x8xf32>
    %87 = vector.shape_cast %86 : vector<1x8x8xf32> to vector<8x8xf32>
    %88 = vector.extract_strided_slice %85 {offsets = [0, 8, 0], sizes = [1, 8, 8], strides = [1, 1, 1]} : vector<2x16x8xf32> to vector<1x8x8xf32>
    %89 = vector.shape_cast %88 : vector<1x8x8xf32> to vector<8x8xf32>
    %90 = vector.extract_strided_slice %85 {offsets = [1, 0, 0], sizes = [1, 8, 8], strides = [1, 1, 1]} : vector<2x16x8xf32> to vector<1x8x8xf32>
    %91 = vector.shape_cast %90 : vector<1x8x8xf32> to vector<8x8xf32>
    %92 = vector.extract_strided_slice %85 {offsets = [1, 8, 0], sizes = [1, 8, 8], strides = [1, 1, 1]} : vector<2x16x8xf32> to vector<1x8x8xf32>
    %93 = vector.shape_cast %92 : vector<1x8x8xf32> to vector<8x8xf32>
    %94 = tpu.concatenate %87, %89, %91, %93 in 1 : vector<8x8xf32>, vector<8x8xf32>, vector<8x8xf32>, vector<8x8xf32> -> vector<8x32xf32>
    %95 = arith.truncf %94 : vector<8x32xf32> to vector<8x32xbf16>
    %c0_25 = arith.constant 0 : index
    %c0_26 = arith.constant 0 : index
    %96 = vector.load %arg14[%c0_25, %c0_26] : memref<32x32xbf16, #tpu.memory_space<vmem>>, vector<32x32xbf16>
    %cst_27 = arith.constant dense<0.000000e+00> : vector<8x32xf32>
    %97 = tpu.matmul %95, %96, %cst_27 {dimension_numbers = #tpu.dot_dimension_numbers<[1], [0], [0], [1], [0, 0, 1, 1], [], []>} : vector<8x32xbf16>, vector<32x32xbf16>, vector<8x32xf32> -> vector<8x32xf32>
    %98 = arith.addf %7, %97 : vector<8x32xf32>
    %c0_28 = arith.constant 0 : index
    %c0_29 = arith.constant 0 : index
    %99 = vector.load %arg10[%c0_28, %c0_29] : memref<1x32xf32, #tpu.memory_space<vmem>>, vector<1x32xf32>
    %100 = arith.mulf %98, %98 : vector<8x32xf32>
    %cst_30 = arith.constant dense<0.000000e+00> : vector<8xf32>
    %101 = vector.multi_reduction <add>, %100, %cst_30 [1] : vector<8x32xf32> to vector<8xf32>
    %102 = vector.shape_cast %101 : vector<8xf32> to vector<8x1xf32>
    %cst_31 = arith.constant 3.200000e+01 : f32
    %103 = vector.broadcast %cst_31 : f32 to vector<8x1xf32>
    %104 = arith.divf %102, %103 : vector<8x1xf32>
    %cst_32 = arith.constant 9.99999974E-6 : f32
    %105 = vector.broadcast %cst_32 : f32 to vector<8x1xf32>
    %106 = arith.addf %104, %105 : vector<8x1xf32>
    %107 = math.rsqrt %106 : vector<8x1xf32>
    %108 = vector.broadcast %107 : vector<8x1xf32> to vector<8x32xf32>
    %109 = arith.mulf %98, %108 : vector<8x32xf32>
    %110 = vector.broadcast %99 : vector<1x32xf32> to vector<8x32xf32>
    %111 = arith.mulf %109, %110 : vector<8x32xf32>
    %112 = arith.truncf %111 : vector<8x32xf32> to vector<8x32xbf16>
    %c0_33 = arith.constant 0 : index
    %c0_34 = arith.constant 0 : index
    %113 = vector.load %arg15[%c0_33, %c0_34] : memref<32x128xbf16, #tpu.memory_space<vmem>>, vector<32x128xbf16>
    %cst_35 = arith.constant dense<0.000000e+00> : vector<8x128xf32>
    %114 = tpu.matmul %112, %113, %cst_35 {dimension_numbers = #tpu.dot_dimension_numbers<[1], [0], [0], [1], [0, 0, 1, 1], [], []>} : vector<8x32xbf16>, vector<32x128xbf16>, vector<8x128xf32> -> vector<8x128xf32>
    %c0_36 = arith.constant 0 : index
    %c0_37 = arith.constant 0 : index
    %115 = vector.load %arg16[%c0_36, %c0_37] : memref<32x128xbf16, #tpu.memory_space<vmem>>, vector<32x128xbf16>
    %cst_38 = arith.constant dense<0.000000e+00> : vector<8x128xf32>
    %116 = tpu.matmul %112, %115, %cst_38 {dimension_numbers = #tpu.dot_dimension_numbers<[1], [0], [0], [1], [0, 0, 1, 1], [], []>} : vector<8x32xbf16>, vector<32x128xbf16>, vector<8x128xf32> -> vector<8x128xf32>
    %117 = arith.negf %114 : vector<8x128xf32>
    %118 = math.exp %117 : vector<8x128xf32>
    %cst_39 = arith.constant 1.000000e+00 : f32
    %119 = vector.broadcast %cst_39 : f32 to vector<8x128xf32>
    %120 = arith.addf %119, %118 : vector<8x128xf32>
    %121 = arith.divf %119, %120 : vector<8x128xf32>
    %122 = arith.mulf %114, %121 : vector<8x128xf32>
    %123 = arith.mulf %122, %116 : vector<8x128xf32>
    %124 = arith.truncf %123 : vector<8x128xf32> to vector<8x128xbf16>
    %c0_40 = arith.constant 0 : index
    %c0_41 = arith.constant 0 : index
    %125 = vector.load %arg17[%c0_40, %c0_41] : memref<128x32xbf16, #tpu.memory_space<vmem>>, vector<128x32xbf16>
    %cst_42 = arith.constant dense<0.000000e+00> : vector<8x32xf32>
    %126 = tpu.matmul %124, %125, %cst_42 {dimension_numbers = #tpu.dot_dimension_numbers<[1], [0], [0], [1], [0, 0, 1, 1], [], []>} : vector<8x128xbf16>, vector<128x32xbf16>, vector<8x32xf32> -> vector<8x32xf32>
    %127 = arith.addf %98, %126 : vector<8x32xf32>
    %c0_43 = arith.constant 0 : index
    %c0_44 = arith.constant 0 : index
    %c0_45 = arith.constant 0 : index
    %128 = vector.load %arg18[%c0_43, %c0_44, %c0_45] : memref<1x8x32xf32, #tpu.memory_space<vmem>>, vector<1x8x32xf32>
    %129 = vector.shape_cast %128 : vector<1x8x32xf32> to vector<8x32xf32>
    %130 = vector.shape_cast %127 : vector<8x32xf32> to vector<1x8x32xf32>
    tpu.vector_store %arg18[%c0_43, %c0_44, %c0_45], %130 {strides = array<i32>} : memref<1x8x32xf32, #tpu.memory_space<vmem>>, vector<1x8x32xf32>,
    return
  }
  func.func @transform_0(%arg0: i32, %arg1: i32) -> (i32, i32, i32) {
    %c0_i32 = arith.constant 0 : i32
    %c0_i32_0 = arith.constant 0 : i32
    %c0_i32_1 = arith.constant 0 : i32
    return %arg0, %c0_i32, %c0_i32_0 : i32, i32, i32
  }
  func.func @transform_1(%arg0: i32, %arg1: i32) -> (i32, i32) {
    %c0_i32 = arith.constant 0 : i32
    %c0_i32_0 = arith.constant 0 : i32
    return %arg1, %c0_i32 : i32, i32
  }
  func.func @transform_2(%arg0: i32, %arg1: i32) -> (i32, i32) {
    %c0_i32 = arith.constant 0 : i32
    %c0_i32_0 = arith.constant 0 : i32
    return %arg1, %c0_i32 : i32, i32
  }
  func.func @transform_3(%arg0: i32, %arg1: i32) -> (i32, i32) {
    %c0_i32 = arith.constant 0 : i32
    %c0_i32_0 = arith.constant 0 : i32
    return %arg1, %c0_i32 : i32, i32
  }
  func.func @transform_4(%arg0: i32, %arg1: i32) -> (i32, i32) {
    %c0_i32 = arith.constant 0 : i32
    %c0_i32_0 = arith.constant 0 : i32
    %c0_i32_1 = arith.constant 0 : i32
    return %c0_i32, %c0_i32_0 : i32, i32
  }
  func.func @transform_5(%arg0: i32, %arg1: i32) -> (i32, i32) {
    %c0_i32 = arith.constant 0 : i32
    %c0_i32_0 = arith.constant 0 : i32
    %c0_i32_1 = arith.constant 0 : i32
    return %c0_i32, %c0_i32_0 : i32, i32
  }
  func.func @transform_6(%arg0: i32, %arg1: i32) -> (i32, i32) {
    %c0_i32 = arith.constant 0 : i32
    %c0_i32_0 = arith.constant 0 : i32
    %c0_i32_1 = arith.constant 0 : i32
    return %c0_i32, %c0_i32_0 : i32, i32
  }
  func.func @transform_7(%arg0: i32, %arg1: i32) -> (i32, i32) {
    %c0_i32 = arith.constant 0 : i32
    %c0_i32_0 = arith.constant 0 : i32
    %c0_i32_1 = arith.constant 0 : i32
    return %c0_i32, %c0_i32_0 : i32, i32
  }
  func.func @transform_8(%arg0: i32, %arg1: i32) -> (i32, i32) {
    %c0_i32 = arith.constant 0 : i32
    %c0_i32_0 = arith.constant 0 : i32
    %c0_i32_1 = arith.constant 0 : i32
    return %c0_i32, %c0_i32_0 : i32, i32
  }
  func.func @transform_9(%arg0: i32, %arg1: i32) -> (i32, i32) {
    %c0_i32 = arith.constant 0 : i32
    %c0_i32_0 = arith.constant 0 : i32
    %c0_i32_1 = arith.constant 0 : i32
    return %c0_i32, %c0_i32_0 : i32, i32
  }
  func.func @transform_10(%arg0: i32, %arg1: i32) -> (i32, i32) {
    %c0_i32 = arith.constant 0 : i32
    %c0_i32_0 = arith.constant 0 : i32
    %c0_i32_1 = arith.constant 0 : i32
    return %c0_i32, %c0_i32_0 : i32, i32
  }
  func.func @transform_11(%arg0: i32, %arg1: i32) -> (i32, i32) {
    %c0_i32 = arith.constant 0 : i32
    %c0_i32_0 = arith.constant 0 : i32
    %c0_i32_1 = arith.constant 0 : i32
    return %c0_i32, %c0_i32_0 : i32, i32
  }
  func.func @transform_12(%arg0: i32, %arg1: i32) -> (i32, i32) {
    %c0_i32 = arith.constant 0 : i32
    %c0_i32_0 = arith.constant 0 : i32
    %c0_i32_1 = arith.constant 0 : i32
    return %c0_i32, %c0_i32_0 : i32, i32
  }
  func.func @transform_13(%arg0: i32, %arg1: i32) -> (i32, i32) {
    %c0_i32 = arith.constant 0 : i32
    %c0_i32_0 = arith.constant 0 : i32
    %c0_i32_1 = arith.constant 0 : i32
    return %c0_i32, %c0_i32_0 : i32, i32
  }
  func.func @transform_14(%arg0: i32, %arg1: i32) -> (i32, i32) {
    %c0_i32 = arith.constant 0 : i32
    %c0_i32_0 = arith.constant 0 : i32
    %c0_i32_1 = arith.constant 0 : i32
    return %c0_i32, %c0_i32_0 : i32, i32
  }
  func.func @transform_15(%arg0: i32, %arg1: i32) -> (i32, i32) {
    %c0_i32 = arith.constant 0 : i32
    %c0_i32_0 = arith.constant 0 : i32
    %c0_i32_1 = arith.constant 0 : i32
    return %c0_i32, %c0_i32_0 : i32, i32
  }
  func.func @transform_16(%arg0: i32, %arg1: i32) -> (i32, i32, i32) {
    %c0_i32 = arith.constant 0 : i32
    %c0_i32_0 = arith.constant 0 : i32
    return %arg0, %arg1, %c0_i32 : i32, i32, i32
  }
}

module attributes {stable_mosaic.version = 11 : i64} {
  func.func @_block_kernel(%arg0: i32, %arg1: i32, %arg2: memref<1x8x32xf32, #tpu.memory_space<vmem>>, %arg3: memref<8x32xf32, #tpu.memory_space<vmem>>, %arg4: memref<8x32xf32, #tpu.memory_space<vmem>>, %arg5: memref<8x32xf32, #tpu.memory_space<vmem>>, %arg6: memref<8x16xf32, #tpu.memory_space<vmem>>, %arg7: memref<8x16xf32, #tpu.memory_space<vmem>>, %arg8: memref<8x16xf32, #tpu.memory_space<vmem>>, %arg9: memref<1x32xf32, #tpu.memory_space<vmem>>, %arg10: memref<1x32xf32, #tpu.memory_space<vmem>>, %arg11: memref<32x32xbf16, #tpu.memory_space<vmem>>, %arg12: memref<32x16xbf16, #tpu.memory_space<vmem>>, %arg13: memref<32x16xbf16, #tpu.memory_space<vmem>>, %arg14: memref<32x32xbf16, #tpu.memory_space<vmem>>, %arg15: memref<32x128xbf16, #tpu.memory_space<vmem>>, %arg16: memref<32x128xbf16, #tpu.memory_space<vmem>>, %arg17: memref<128x32xbf16, #tpu.memory_space<vmem>>, %arg18: memref<1x8x32xf32, #tpu.memory_space<vmem>>, %arg19: memref<8x16xbf16, #tpu.memory_space<vmem>>, %arg20: memref<8x16xbf16, #tpu.memory_space<vmem>>) attributes {dimension_semantics = [#tpu.dimension_semantics<parallel>, #tpu.dimension_semantics<arbitrary>], iteration_bounds = array<i64: 2, 1>, scalar_prefetch = 0 : i64, scratch_operands = 2 : i64, tpu.core_type = #tpu.core_type<tc>, window_params = [{transform_indices = @transform_0, window_bounds = array<i64: 1, 8, 32>}, {transform_indices = @transform_1, window_bounds = array<i64: 8, 32>}, {transform_indices = @transform_2, window_bounds = array<i64: 8, 32>}, {transform_indices = @transform_3, window_bounds = array<i64: 8, 32>}, {pipeline_mode = #tpu.pipeline_mode<synchronous>, transform_indices = @transform_4, window_bounds = array<i64: 8, 16>}, {pipeline_mode = #tpu.pipeline_mode<synchronous>, transform_indices = @transform_5, window_bounds = array<i64: 8, 16>}, {pipeline_mode = #tpu.pipeline_mode<synchronous>, transform_indices = @transform_6, window_bounds = array<i64: 8, 16>}, {pipeline_mode = #tpu.pipeline_mode<synchronous>, transform_indices = @transform_7, window_bounds = array<i64: 1, 32>}, {pipeline_mode = #tpu.pipeline_mode<synchronous>, transform_indices = @transform_8, window_bounds = array<i64: 1, 32>}, {pipeline_mode = #tpu.pipeline_mode<synchronous>, transform_indices = @transform_9, window_bounds = array<i64: 32, 32>}, {pipeline_mode = #tpu.pipeline_mode<synchronous>, transform_indices = @transform_10, window_bounds = array<i64: 32, 16>}, {pipeline_mode = #tpu.pipeline_mode<synchronous>, transform_indices = @transform_11, window_bounds = array<i64: 32, 16>}, {pipeline_mode = #tpu.pipeline_mode<synchronous>, transform_indices = @transform_12, window_bounds = array<i64: 32, 32>}, {pipeline_mode = #tpu.pipeline_mode<synchronous>, transform_indices = @transform_13, window_bounds = array<i64: 32, 128>}, {pipeline_mode = #tpu.pipeline_mode<synchronous>, transform_indices = @transform_14, window_bounds = array<i64: 32, 128>}, {pipeline_mode = #tpu.pipeline_mode<synchronous>, transform_indices = @transform_15, window_bounds = array<i64: 128, 32>}, {transform_indices = @transform_16, window_bounds = array<i64: 1, 8, 32>}]} {
    %c0_i32 = arith.constant 0 : i32
    %0 = arith.cmpi eq, %arg1, %c0_i32 : i32
    %1 = arith.extui %0 : i1 to i32
    %c0_i32_0 = arith.constant 0 : i32
    %2 = arith.cmpi ne, %1, %c0_i32_0 : i32
    scf.if %2 {
      %c0_46 = arith.constant 0 : index
      %c0_47 = arith.constant 0 : index
      %c0_48 = arith.constant 0 : index
      %131 = vector.load %arg2[%c0_46, %c0_47, %c0_48] : memref<1x8x32xf32, #tpu.memory_space<vmem>>, vector<1x8x32xf32>
      %132 = vector.shape_cast %131 : vector<1x8x32xf32> to vector<8x32xf32>
      %c0_49 = arith.constant 0 : index
      %c0_50 = arith.constant 0 : index
      %133 = vector.load %arg9[%c0_49, %c0_50] : memref<1x32xf32, #tpu.memory_space<vmem>>, vector<1x32xf32>
      %134 = arith.mulf %132, %132 : vector<8x32xf32>
      %cst_51 = arith.constant dense<0.000000e+00> : vector<8xf32>
      %135 = vector.multi_reduction <add>, %134, %cst_51 [1] : vector<8x32xf32> to vector<8xf32>
      %136 = vector.shape_cast %135 : vector<8xf32> to vector<8x1xf32>
      %cst_52 = arith.constant 3.200000e+01 : f32
      %137 = vector.broadcast %cst_52 : f32 to vector<8x1xf32>
      %138 = arith.divf %136, %137 : vector<8x1xf32>
      %cst_53 = arith.constant 9.99999974E-6 : f32
      %139 = vector.broadcast %cst_53 : f32 to vector<8x1xf32>
      %140 = arith.addf %138, %139 : vector<8x1xf32>
      %141 = math.rsqrt %140 : vector<8x1xf32>
      %142 = vector.broadcast %141 : vector<8x1xf32> to vector<8x32xf32>
      %143 = arith.mulf %132, %142 : vector<8x32xf32>
      %144 = vector.broadcast %133 : vector<1x32xf32> to vector<8x32xf32>
      %145 = arith.mulf %143, %144 : vector<8x32xf32>
      %146 = arith.truncf %145 : vector<8x32xf32> to vector<8x32xbf16>
      %c0_54 = arith.constant 0 : index
      %c0_55 = arith.constant 0 : index
      %147 = vector.load %arg12[%c0_54, %c0_55] : memref<32x16xbf16, #tpu.memory_space<vmem>>, vector<32x16xbf16>
      %cst_56 = arith.constant dense<0.000000e+00> : vector<8x16xf32>
      %148 = tpu.matmul %146, %147, %cst_56 {dimension_numbers = #tpu.dot_dimension_numbers<[1], [0], [0], [1], [0, 0, 1, 1], [], []>} : vector<8x32xbf16>, vector<32x16xbf16>, vector<8x16xf32> -> vector<8x16xf32>
      %c0_57 = arith.constant 0 : index
      %c0_58 = arith.constant 0 : index
      %149 = vector.load %arg13[%c0_57, %c0_58] : memref<32x16xbf16, #tpu.memory_space<vmem>>, vector<32x16xbf16>
      %cst_59 = arith.constant dense<0.000000e+00> : vector<8x16xf32>
      %150 = tpu.matmul %146, %149, %cst_59 {dimension_numbers = #tpu.dot_dimension_numbers<[1], [0], [0], [1], [0, 0, 1, 1], [], []>} : vector<8x32xbf16>, vector<32x16xbf16>, vector<8x16xf32> -> vector<8x16xf32>
      %c0_60 = arith.constant 0 : index
      %c0_61 = arith.constant 0 : index
      %151 = vector.load %arg6[%c0_60, %c0_61] : memref<8x16xf32, #tpu.memory_space<vmem>>, vector<8x16xf32>
      %c0_62 = arith.constant 0 : index
      %c0_63 = arith.constant 0 : index
      %152 = vector.load %arg7[%c0_62, %c0_63] : memref<8x16xf32, #tpu.memory_space<vmem>>, vector<8x16xf32>
      %c0_64 = arith.constant 0 : index
      %c0_65 = arith.constant 0 : index
      %153 = vector.load %arg8[%c0_64, %c0_65] : memref<8x16xf32, #tpu.memory_space<vmem>>, vector<8x16xf32>
      %154 = arith.mulf %148, %151 : vector<8x16xf32>
      %155 = vector.extract_strided_slice %148 {offsets = [0, 4], sizes = [8, 12], strides = [1, 1]} : vector<8x16xf32> to vector<8x12xf32>
      %156 = vector.extract_strided_slice %148 {offsets = [0, 0], sizes = [8, 4], strides = [1, 1]} : vector<8x16xf32> to vector<8x4xf32>
      %157 = tpu.concatenate %155, %156 in 1 : vector<8x12xf32>, vector<8x4xf32> -> vector<8x16xf32>
      %158 = arith.mulf %157, %152 : vector<8x16xf32>
      %159 = arith.addf %154, %158 : vector<8x16xf32>
      %160 = vector.extract_strided_slice %148 {offsets = [0, 12], sizes = [8, 4], strides = [1, 1]} : vector<8x16xf32> to vector<8x4xf32>
      %161 = vector.extract_strided_slice %148 {offsets = [0, 0], sizes = [8, 12], strides = [1, 1]} : vector<8x16xf32> to vector<8x12xf32>
      %162 = tpu.concatenate %160, %161 in 1 : vector<8x4xf32>, vector<8x12xf32> -> vector<8x16xf32>
      %163 = arith.mulf %162, %153 : vector<8x16xf32>
      %164 = arith.addf %159, %163 : vector<8x16xf32>
      %165 = arith.truncf %164 : vector<8x16xf32> to vector<8x16xbf16>
      %c0_66 = arith.constant 0 : index
      %c0_67 = arith.constant 0 : index
      %166 = vector.load %arg19[%c0_66, %c0_67] : memref<8x16xbf16, #tpu.memory_space<vmem>>, vector<8x16xbf16>
      tpu.vector_store %arg19[%c0_66, %c0_67], %165 {strides = array<i32>} : memref<8x16xbf16, #tpu.memory_space<vmem>>, vector<8x16xbf16>,
      %167 = arith.truncf %150 : vector<8x16xf32> to vector<8x16xbf16>
      %c0_68 = arith.constant 0 : index
      %c0_69 = arith.constant 0 : index
      %168 = vector.load %arg20[%c0_68, %c0_69] : memref<8x16xbf16, #tpu.memory_space<vmem>>, vector<8x16xbf16>
      tpu.vector_store %arg20[%c0_68, %c0_69], %167 {strides = array<i32>} : memref<8x16xbf16, #tpu.memory_space<vmem>>, vector<8x16xbf16>,
    } else {
    }
    %c8_i32 = arith.constant 8 : i32
    %3 = arith.muli %arg1, %c8_i32 : i32
    %4 = tpu.assume_multiple %3, 8 : i32
    %c0 = arith.constant 0 : index
    %5 = arith.index_cast %4 : i32 to index
    %c0_1 = arith.constant 0 : index
    %6 = vector.load %arg2[%c0, %5, %c0_1] : memref<1x8x32xf32, #tpu.memory_space<vmem>>, vector<1x8x32xf32>
    %7 = vector.shape_cast %6 : vector<1x8x32xf32> to vector<8x32xf32>
    %c0_2 = arith.constant 0 : index
    %c0_3 = arith.constant 0 : index
    %8 = vector.load %arg9[%c0_2, %c0_3] : memref<1x32xf32, #tpu.memory_space<vmem>>, vector<1x32xf32>
    %9 = arith.mulf %7, %7 : vector<8x32xf32>
    %cst = arith.constant dense<0.000000e+00> : vector<8xf32>
    %10 = vector.multi_reduction <add>, %9, %cst [1] : vector<8x32xf32> to vector<8xf32>
    %11 = vector.shape_cast %10 : vector<8xf32> to vector<8x1xf32>
    %cst_4 = arith.constant 3.200000e+01 : f32
    %12 = vector.broadcast %cst_4 : f32 to vector<8x1xf32>
    %13 = arith.divf %11, %12 : vector<8x1xf32>
    %cst_5 = arith.constant 9.99999974E-6 : f32
    %14 = vector.broadcast %cst_5 : f32 to vector<8x1xf32>
    %15 = arith.addf %13, %14 : vector<8x1xf32>
    %16 = math.rsqrt %15 : vector<8x1xf32>
    %17 = vector.broadcast %16 : vector<8x1xf32> to vector<8x32xf32>
    %18 = arith.mulf %7, %17 : vector<8x32xf32>
    %19 = vector.broadcast %8 : vector<1x32xf32> to vector<8x32xf32>
    %20 = arith.mulf %18, %19 : vector<8x32xf32>
    %21 = arith.truncf %20 : vector<8x32xf32> to vector<8x32xbf16>
    %c0_6 = arith.constant 0 : index
    %c0_7 = arith.constant 0 : index
    %22 = vector.load %arg11[%c0_6, %c0_7] : memref<32x32xbf16, #tpu.memory_space<vmem>>, vector<32x32xbf16>
    %cst_8 = arith.constant dense<0.000000e+00> : vector<8x32xf32>
    %23 = tpu.matmul %21, %22, %cst_8 {dimension_numbers = #tpu.dot_dimension_numbers<[1], [0], [0], [1], [0, 0, 1, 1], [], []>} : vector<8x32xbf16>, vector<32x32xbf16>, vector<8x32xf32> -> vector<8x32xf32>
    %c0_9 = arith.constant 0 : index
    %c0_10 = arith.constant 0 : index
    %24 = vector.load %arg3[%c0_9, %c0_10] : memref<8x32xf32, #tpu.memory_space<vmem>>, vector<8x32xf32>
    %c0_11 = arith.constant 0 : index
    %c0_12 = arith.constant 0 : index
    %25 = vector.load %arg4[%c0_11, %c0_12] : memref<8x32xf32, #tpu.memory_space<vmem>>, vector<8x32xf32>
    %c0_13 = arith.constant 0 : index
    %c0_14 = arith.constant 0 : index
    %26 = vector.load %arg5[%c0_13, %c0_14] : memref<8x32xf32, #tpu.memory_space<vmem>>, vector<8x32xf32>
    %27 = arith.mulf %23, %24 : vector<8x32xf32>
    %28 = vector.extract_strided_slice %23 {offsets = [0, 4], sizes = [8, 28], strides = [1, 1]} : vector<8x32xf32> to vector<8x28xf32>
    %29 = vector.extract_strided_slice %23 {offsets = [0, 0], sizes = [8, 4], strides = [1, 1]} : vector<8x32xf32> to vector<8x4xf32>
    %30 = tpu.concatenate %28, %29 in 1 : vector<8x28xf32>, vector<8x4xf32> -> vector<8x32xf32>
    %31 = arith.mulf %30, %25 : vector<8x32xf32>
    %32 = arith.addf %27, %31 : vector<8x32xf32>
    %33 = vector.extract_strided_slice %23 {offsets = [0, 28], sizes = [8, 4], strides = [1, 1]} : vector<8x32xf32> to vector<8x4xf32>
    %34 = vector.extract_strided_slice %23 {offsets = [0, 0], sizes = [8, 28], strides = [1, 1]} : vector<8x32xf32> to vector<8x28xf32>
    %35 = tpu.concatenate %33, %34 in 1 : vector<8x4xf32>, vector<8x28xf32> -> vector<8x32xf32>
    %36 = arith.mulf %35, %26 : vector<8x32xf32>
    %37 = arith.addf %32, %36 : vector<8x32xf32>
    %38 = arith.truncf %37 : vector<8x32xf32> to vector<8x32xbf16>
    %c0_15 = arith.constant 0 : index
    %c0_16 = arith.constant 0 : index
    %39 = vector.load %arg19[%c0_15, %c0_16] : memref<8x16xbf16, #tpu.memory_space<vmem>>, vector<8x16xbf16>
    %c0_17 = arith.constant 0 : index
    %c0_18 = arith.constant 0 : index
    %40 = vector.load %arg20[%c0_17, %c0_18] : memref<8x16xbf16, #tpu.memory_space<vmem>>, vector<8x16xbf16>
    %41 = vector.extract_strided_slice %38 {offsets = [0, 0], sizes = [8, 8], strides = [1, 1]} : vector<8x32xbf16> to vector<8x8xbf16>
    %42 = vector.extract_strided_slice %38 {offsets = [0, 8], sizes = [8, 8], strides = [1, 1]} : vector<8x32xbf16> to vector<8x8xbf16>
    %43 = tpu.concatenate %41, %42 in 0 : vector<8x8xbf16>, vector<8x8xbf16> -> vector<16x8xbf16>
    %44 = vector.extract_strided_slice %38 {offsets = [0, 16], sizes = [8, 8], strides = [1, 1]} : vector<8x32xbf16> to vector<8x8xbf16>
    %45 = vector.extract_strided_slice %38 {offsets = [0, 24], sizes = [8, 8], strides = [1, 1]} : vector<8x32xbf16> to vector<8x8xbf16>
    %46 = tpu.concatenate %44, %45 in 0 : vector<8x8xbf16>, vector<8x8xbf16> -> vector<16x8xbf16>
    %47 = vector.shape_cast %43 : vector<16x8xbf16> to vector<1x16x8xbf16>
    %48 = vector.shape_cast %46 : vector<16x8xbf16> to vector<1x16x8xbf16>
    %49 = tpu.concatenate %47, %48 in 0 : vector<1x16x8xbf16>, vector<1x16x8xbf16> -> vector<2x16x8xbf16>
    %50 = vector.extract_strided_slice %39 {offsets = [0, 0], sizes = [8, 8], strides = [1, 1]} : vector<8x16xbf16> to vector<8x8xbf16>
    %51 = vector.extract_strided_slice %39 {offsets = [0, 8], sizes = [8, 8], strides = [1, 1]} : vector<8x16xbf16> to vector<8x8xbf16>
    %52 = vector.shape_cast %50 : vector<8x8xbf16> to vector<1x8x8xbf16>
    %53 = vector.shape_cast %51 : vector<8x8xbf16> to vector<1x8x8xbf16>
    %54 = tpu.concatenate %52, %53 in 0 : vector<1x8x8xbf16>, vector<1x8x8xbf16> -> vector<2x8x8xbf16>
    %55 = vector.extract_strided_slice %40 {offsets = [0, 0], sizes = [8, 8], strides = [1, 1]} : vector<8x16xbf16> to vector<8x8xbf16>
    %56 = vector.extract_strided_slice %40 {offsets = [0, 8], sizes = [8, 8], strides = [1, 1]} : vector<8x16xbf16> to vector<8x8xbf16>
    %57 = vector.shape_cast %55 : vector<8x8xbf16> to vector<1x8x8xbf16>
    %58 = vector.shape_cast %56 : vector<8x8xbf16> to vector<1x8x8xbf16>
    %59 = tpu.concatenate %57, %58 in 0 : vector<1x8x8xbf16>, vector<1x8x8xbf16> -> vector<2x8x8xbf16>
    "tpu.trace_start"() <{level = 10 : i32, message = "gqd,gkd->gqk"}> : () -> ()
    %cst_19 = arith.constant dense<0.000000e+00> : vector<2x16x8xf32>
    %60 = tpu.matmul %49, %54, %cst_19 {dimension_numbers = #tpu.dot_dimension_numbers<[2], [2], [1], [1], [0, 0, 0, 1, 1, 1], [0], [0]>} : vector<2x16x8xbf16>, vector<2x8x8xbf16>, vector<2x16x8xf32> -> vector<2x16x8xf32>
    "tpu.trace_stop"() : () -> ()
    %cst_20 = arith.constant 0.353553385 : f32
    %61 = vector.broadcast %cst_20 : f32 to vector<2x16x8xf32>
    %62 = arith.mulf %60, %61 : vector<2x16x8xf32>
    %63 = tpu.iota {dimensions = array<i32: 0>} : vector<8x8xi32>
    %64 = tpu.iota {dimensions = array<i32: 1>} : vector<8x8xi32>
    %65 = vector.broadcast %3 : i32 to vector<8x8xi32>
    %66 = arith.addi %63, %65 : vector<8x8xi32>
    %67 = arith.cmpi sgt, %64, %66 : vector<8x8xi32>
    %68 = tpu.concatenate %67, %67 in 0 : vector<8x8xi1>, vector<8x8xi1> -> vector<16x8xi1>
    %69 = vector.shape_cast %68 : vector<16x8xi1> to vector<1x16x8xi1>
    %cst_21 = arith.constant 0xFF800000 : f32
    %70 = vector.shape_cast %69 : vector<1x16x8xi1> to vector<1x16x8xi1>
    %71 = vector.broadcast %70 : vector<1x16x8xi1> to vector<2x16x8xi1>
    %72 = vector.broadcast %cst_21 : f32 to vector<2x16x8xf32>
    %73 = arith.select %71, %72, %62 : vector<2x16x8xi1>, vector<2x16x8xf32>
    %cst_22 = arith.constant dense<0xFF800000> : vector<2x16xf32>
    %74 = vector.multi_reduction <maximumf>, %73, %cst_22 [2] : vector<2x16x8xf32> to vector<2x16xf32>
    %75 = vector.shape_cast %74 : vector<2x16xf32> to vector<2x16x1xf32>
    %76 = vector.broadcast %75 : vector<2x16x1xf32> to vector<2x16x8xf32>
    %77 = arith.subf %73, %76 : vector<2x16x8xf32>
    %78 = math.exp %77 : vector<2x16x8xf32>
    %cst_23 = arith.constant dense<0.000000e+00> : vector<2x16xf32>
    %79 = vector.multi_reduction <add>, %78, %cst_23 [2] : vector<2x16x8xf32> to vector<2x16xf32>
    %80 = vector.shape_cast %79 : vector<2x16xf32> to vector<2x16x1xf32>
    %81 = arith.truncf %78 : vector<2x16x8xf32> to vector<2x16x8xbf16>
    "tpu.trace_start"() <{level = 10 : i32, message = "gqk,gkd->gqd"}> : () -> ()
    %cst_24 = arith.constant dense<0.000000e+00> : vector<2x16x8xf32>
    %82 = tpu.matmul %81, %59, %cst_24 {dimension_numbers = #tpu.dot_dimension_numbers<[2], [1], [1], [2], [0, 0, 0, 1, 1, 2], [0], [0]>} : vector<2x16x8xbf16>, vector<2x8x8xbf16>, vector<2x16x8xf32> -> vector<2x16x8xf32>
    "tpu.trace_stop"() : () -> ()
    %83 = tpu.reciprocal %80 {approx = true} : vector<2x16x1xf32> -> vector<2x16x1xf32>
    %84 = vector.broadcast %83 : vector<2x16x1xf32> to vector<2x16x8xf32>
    %85 = arith.mulf %82, %84 : vector<2x16x8xf32>
    %86 = vector.extract_strided_slice %85 {offsets = [0, 0, 0], sizes = [1, 8, 8], strides = [1, 1, 1]} : vector<2x16x8xf32> to vector<1x8x8xf32>
    %87 = vector.shape_cast %86 : vector<1x8x8xf32> to vector<8x8xf32>
    %88 = vector.extract_strided_slice %85 {offsets = [0, 8, 0], sizes = [1, 8, 8], strides = [1, 1, 1]} : vector<2x16x8xf32> to vector<1x8x8xf32>
    %89 = vector.shape_cast %88 : vector<1x8x8xf32> to vector<8x8xf32>
    %90 = vector.extract_strided_slice %85 {offsets = [1, 0, 0], sizes = [1, 8, 8], strides = [1, 1, 1]} : vector<2x16x8xf32> to vector<1x8x8xf32>
    %91 = vector.shape_cast %90 : vector<1x8x8xf32> to vector<8x8xf32>
    %92 = vector.extract_strided_slice %85 {offsets = [1, 8, 0], sizes = [1, 8, 8], strides = [1, 1, 1]} : vector<2x16x8xf32> to vector<1x8x8xf32>
    %93 = vector.shape_cast %92 : vector<1x8x8xf32> to vector<8x8xf32>
    %94 = tpu.concatenate %87, %89, %91, %93 in 1 : vector<8x8xf32>, vector<8x8xf32>, vector<8x8xf32>, vector<8x8xf32> -> vector<8x32xf32>
    %95 = arith.truncf %94 : vector<8x32xf32> to vector<8x32xbf16>
    %c0_25 = arith.constant 0 : index
    %c0_26 = arith.constant 0 : index
    %96 = vector.load %arg14[%c0_25, %c0_26] : memref<32x32xbf16, #tpu.memory_space<vmem>>, vector<32x32xbf16>
    %cst_27 = arith.constant dense<0.000000e+00> : vector<8x32xf32>
    %97 = tpu.matmul %95, %96, %cst_27 {dimension_numbers = #tpu.dot_dimension_numbers<[1], [0], [0], [1], [0, 0, 1, 1], [], []>} : vector<8x32xbf16>, vector<32x32xbf16>, vector<8x32xf32> -> vector<8x32xf32>
    %98 = arith.addf %7, %97 : vector<8x32xf32>
    %c0_28 = arith.constant 0 : index
    %c0_29 = arith.constant 0 : index
    %99 = vector.load %arg10[%c0_28, %c0_29] : memref<1x32xf32, #tpu.memory_space<vmem>>, vector<1x32xf32>
    %100 = arith.mulf %98, %98 : vector<8x32xf32>
    %cst_30 = arith.constant dense<0.000000e+00> : vector<8xf32>
    %101 = vector.multi_reduction <add>, %100, %cst_30 [1] : vector<8x32xf32> to vector<8xf32>
    %102 = vector.shape_cast %101 : vector<8xf32> to vector<8x1xf32>
    %cst_31 = arith.constant 3.200000e+01 : f32
    %103 = vector.broadcast %cst_31 : f32 to vector<8x1xf32>
    %104 = arith.divf %102, %103 : vector<8x1xf32>
    %cst_32 = arith.constant 9.99999974E-6 : f32
    %105 = vector.broadcast %cst_32 : f32 to vector<8x1xf32>
    %106 = arith.addf %104, %105 : vector<8x1xf32>
    %107 = math.rsqrt %106 : vector<8x1xf32>
    %108 = vector.broadcast %107 : vector<8x1xf32> to vector<8x32xf32>
    %109 = arith.mulf %98, %108 : vector<8x32xf32>
    %110 = vector.broadcast %99 : vector<1x32xf32> to vector<8x32xf32>
    %111 = arith.mulf %109, %110 : vector<8x32xf32>
    %112 = arith.truncf %111 : vector<8x32xf32> to vector<8x32xbf16>
    %c0_33 = arith.constant 0 : index
    %c0_34 = arith.constant 0 : index
    %113 = vector.load %arg15[%c0_33, %c0_34] : memref<32x128xbf16, #tpu.memory_space<vmem>>, vector<32x128xbf16>
    %cst_35 = arith.constant dense<0.000000e+00> : vector<8x128xf32>
    %114 = tpu.matmul %112, %113, %cst_35 {dimension_numbers = #tpu.dot_dimension_numbers<[1], [0], [0], [1], [0, 0, 1, 1], [], []>} : vector<8x32xbf16>, vector<32x128xbf16>, vector<8x128xf32> -> vector<8x128xf32>
    %c0_36 = arith.constant 0 : index
    %c0_37 = arith.constant 0 : index
    %115 = vector.load %arg16[%c0_36, %c0_37] : memref<32x128xbf16, #tpu.memory_space<vmem>>, vector<32x128xbf16>
    %cst_38 = arith.constant dense<0.000000e+00> : vector<8x128xf32>
    %116 = tpu.matmul %112, %115, %cst_38 {dimension_numbers = #tpu.dot_dimension_numbers<[1], [0], [0], [1], [0, 0, 1, 1], [], []>} : vector<8x32xbf16>, vector<32x128xbf16>, vector<8x128xf32> -> vector<8x128xf32>
    %117 = arith.negf %114 : vector<8x128xf32>
    %118 = math.exp %117 : vector<8x128xf32>
    %cst_39 = arith.constant 1.000000e+00 : f32
    %119 = vector.broadcast %cst_39 : f32 to vector<8x128xf32>
    %120 = arith.addf %119, %118 : vector<8x128xf32>
    %121 = arith.divf %119, %120 : vector<8x128xf32>
    %122 = arith.mulf %114, %121 : vector<8x128xf32>
    %123 = arith.mulf %122, %116 : vector<8x128xf32>
    %124 = arith.truncf %123 : vector<8x128xf32> to vector<8x128xbf16>
    %c0_40 = arith.constant 0 : index
    %c0_41 = arith.constant 0 : index
    %125 = vector.load %arg17[%c0_40, %c0_41] : memref<128x32xbf16, #tpu.memory_space<vmem>>, vector<128x32xbf16>
    %cst_42 = arith.constant dense<0.000000e+00> : vector<8x32xf32>
    %126 = tpu.matmul %124, %125, %cst_42 {dimension_numbers = #tpu.dot_dimension_numbers<[1], [0], [0], [1], [0, 0, 1, 1], [], []>} : vector<8x128xbf16>, vector<128x32xbf16>, vector<8x32xf32> -> vector<8x32xf32>
    %127 = arith.addf %98, %126 : vector<8x32xf32>
    %c0_43 = arith.constant 0 : index
    %c0_44 = arith.constant 0 : index
    %c0_45 = arith.constant 0 : index
    %128 = vector.load %arg18[%c0_43, %c0_44, %c0_45] : memref<1x8x32xf32, #tpu.memory_space<vmem>>, vector<1x8x32xf32>
    %129 = vector.shape_cast %128 : vector<1x8x32xf32> to vector<8x32xf32>
    %130 = vector.shape_cast %127 : vector<8x32xf32> to vector<1x8x32xf32>
    tpu.vector_store %arg18[%c0_43, %c0_44, %c0_45], %130 {strides = array<i32>} : memref<1x8x32xf32, #tpu.memory_space<vmem>>, vector<1x8x32xf32>,
    return
  }
  func.func @transform_0(%arg0: i32, %arg1: i32) -> (i32, i32, i32) {
    %c0_i32 = arith.constant 0 : i32
    %c0_i32_0 = arith.constant 0 : i32
    %c0_i32_1 = arith.constant 0 : i32
    return %arg0, %c0_i32, %c0_i32_0 : i32, i32, i32
  }
  func.func @transform_1(%arg0: i32, %arg1: i32) -> (i32, i32) {
    %c0_i32 = arith.constant 0 : i32
    %c0_i32_0 = arith.constant 0 : i32
    return %arg1, %c0_i32 : i32, i32
  }
  func.func @transform_2(%arg0: i32, %arg1: i32) -> (i32, i32) {
    %c0_i32 = arith.constant 0 : i32
    %c0_i32_0 = arith.constant 0 : i32
    return %arg1, %c0_i32 : i32, i32
  }
  func.func @transform_3(%arg0: i32, %arg1: i32) -> (i32, i32) {
    %c0_i32 = arith.constant 0 : i32
    %c0_i32_0 = arith.constant 0 : i32
    return %arg1, %c0_i32 : i32, i32
  }
  func.func @transform_4(%arg0: i32, %arg1: i32) -> (i32, i32) {
    %c0_i32 = arith.constant 0 : i32
    %c0_i32_0 = arith.constant 0 : i32
    %c0_i32_1 = arith.constant 0 : i32
    return %c0_i32, %c0_i32_0 : i32, i32
  }
  func.func @transform_5(%arg0: i32, %arg1: i32) -> (i32, i32) {
    %c0_i32 = arith.constant 0 : i32
    %c0_i32_0 = arith.constant 0 : i32
    %c0_i32_1 = arith.constant 0 : i32
    return %c0_i32, %c0_i32_0 : i32, i32
  }
  func.func @transform_6(%arg0: i32, %arg1: i32) -> (i32, i32) {
    %c0_i32 = arith.constant 0 : i32
    %c0_i32_0 = arith.constant 0 : i32
    %c0_i32_1 = arith.constant 0 : i32
    return %c0_i32, %c0_i32_0 : i32, i32
  }
  func.func @transform_7(%arg0: i32, %arg1: i32) -> (i32, i32) {
    %c0_i32 = arith.constant 0 : i32
    %c0_i32_0 = arith.constant 0 : i32
    %c0_i32_1 = arith.constant 0 : i32
    return %c0_i32, %c0_i32_0 : i32, i32
  }
  func.func @transform_8(%arg0: i32, %arg1: i32) -> (i32, i32) {
    %c0_i32 = arith.constant 0 : i32
    %c0_i32_0 = arith.constant 0 : i32
    %c0_i32_1 = arith.constant 0 : i32
    return %c0_i32, %c0_i32_0 : i32, i32
  }
  func.func @transform_9(%arg0: i32, %arg1: i32) -> (i32, i32) {
    %c0_i32 = arith.constant 0 : i32
    %c0_i32_0 = arith.constant 0 : i32
    %c0_i32_1 = arith.constant 0 : i32
    return %c0_i32, %c0_i32_0 : i32, i32
  }
  func.func @transform_10(%arg0: i32, %arg1: i32) -> (i32, i32) {
    %c0_i32 = arith.constant 0 : i32
    %c0_i32_0 = arith.constant 0 : i32
    %c0_i32_1 = arith.constant 0 : i32
    return %c0_i32, %c0_i32_0 : i32, i32
  }
  func.func @transform_11(%arg0: i32, %arg1: i32) -> (i32, i32) {
    %c0_i32 = arith.constant 0 : i32
    %c0_i32_0 = arith.constant 0 : i32
    %c0_i32_1 = arith.constant 0 : i32
    return %c0_i32, %c0_i32_0 : i32, i32
  }
  func.func @transform_12(%arg0: i32, %arg1: i32) -> (i32, i32) {
    %c0_i32 = arith.constant 0 : i32
    %c0_i32_0 = arith.constant 0 : i32
    %c0_i32_1 = arith.constant 0 : i32
    return %c0_i32, %c0_i32_0 : i32, i32
  }
  func.func @transform_13(%arg0: i32, %arg1: i32) -> (i32, i32) {
    %c0_i32 = arith.constant 0 : i32
    %c0_i32_0 = arith.constant 0 : i32
    %c0_i32_1 = arith.constant 0 : i32
    return %c0_i32, %c0_i32_0 : i32, i32
  }
  func.func @transform_14(%arg0: i32, %arg1: i32) -> (i32, i32) {
    %c0_i32 = arith.constant 0 : i32
    %c0_i32_0 = arith.constant 0 : i32
    %c0_i32_1 = arith.constant 0 : i32
    return %c0_i32, %c0_i32_0 : i32, i32
  }
  func.func @transform_15(%arg0: i32, %arg1: i32) -> (i32, i32) {
    %c0_i32 = arith.constant 0 : i32
    %c0_i32_0 = arith.constant 0 : i32
    %c0_i32_1 = arith.constant 0 : i32
    return %c0_i32, %c0_i32_0 : i32, i32
  }
  func.func @transform_16(%arg0: i32, %arg1: i32) -> (i32, i32, i32) {
    %c0_i32 = arith.constant 0 : i32
    %c0_i32_0 = arith.constant 0 : i32
    return %arg0, %arg1, %c0_i32 : i32, i32, i32
  }
}

</mosaic_0001>

<bundles_post_ra>
// kernel: tpu_custom_call.1
= control target key start
LH: loop header
LB: loop body
LE: loop exit
PB: predicated region body
PF: predicated region fallthrough
CT: control target
= control target key end

     0   :  { %s2553_s0 = inlined_call_operand.vmem [shape: f32[2,8,32], index: 0, kind: input, shape index: {}]   ;;  %s2554_s1 = inlined_call_operand.vmem [shape: f32[8,32], index: 1, kind: input, shape index: {}]   ;;  %s2555_s2 = inlined_call_operand.vmem [shape: f32[8,32], index: 2, kind: input, shape index: {}]   ;;  %s2556_s3 = inlined_call_operand.vmem [shape: f32[8,32], index: 3, kind: input, shape index: {}]   ;;  %s2557_s4 = inlined_call_operand.hbm [shape: f32[8,16], index: 4, kind: input, shape index: {}]   ;;  %s2558_s5 = inlined_call_operand.vmem [shape: f32[8,16], index: 5, kind: input, shape index: {}]   ;;  %s2559_s6 = inlined_call_operand.hbm [shape: f32[8,16], index: 6, kind: input, shape index: {}]   ;;  %s2560_s7 = inlined_call_operand.vmem [shape: f32[1,32], index: 7, kind: input, shape index: {}]   ;;  %s2561_s8 = inlined_call_operand.vmem [shape: f32[1,32], index: 8, kind: input, shape index: {}]   ;;  %s2562_s9 = inlined_call_operand.vmem [shape: bf16[32,32], index: 9, kind: input, shape index: {}]   ;;  %s2563_s10 = inlined_call_operand.vmem [shape: bf16[32,16], index: 10, kind: input, shape index: {}]   ;;  %s2564_s11 = inlined_call_operand.vmem [shape: bf16[32,16], index: 11, kind: input, shape index: {}]   ;;  %s2565_s12 = inlined_call_operand.vmem [shape: bf16[32,32], index: 12, kind: input, shape index: {}]   ;;  %s2566_s13 = inlined_call_operand.vmem [shape: bf16[32,128], index: 13, kind: input, shape index: {}]   ;;  %s2567_s14 = inlined_call_operand.vmem [shape: bf16[32,128], index: 14, kind: input, shape index: {}]   ;;  %s2568_s15 = inlined_call_operand.vmem [shape: bf16[128,32], index: 15, kind: input, shape index: {}]   ;;  %s2569_s16 = inlined_call_operand.hbm [shape: f32[2,8,32], index: 16, kind: output, shape index: {}]  }
   0x1   :  { %2584 = sst [smem:[#allocation21_spill]] %s2553_s0 }
   0x2   :  { %2585 = sst [smem:[#allocation22_spill]] %s2569_s16 }
   0x3   :  { %21 = vsyncpa [#allocation5], 0 }
   0x4   :  { %22 = vsyncpa [#allocation8], 0 }
   0x5   :  { %23 = vsyncpa [#allocation6], 0 }
   0x6   :  { %25 = vsyncpa [#allocation6 + $0x1], 0  ;;  %s2191_s21 = smov 0   ;;  %s2193_s22 = smov 0  }
   0x7   :  { %s2195_s23 = smov 0   ;;  %s2197_s24 = smov 0  }
   0x8   :  { %s2199_s25 = smov 0   ;;  %s2201_s26 = smov 0  }
   0x9 LB: > { %2586 = sst [smem:[#allocation13_spill]] %s2068_s21  ;;  %s1632_s27 = sadd.s32 4294967295, %s2088_s26   ;;  %s2088_s26 = sphi %s2201_s26, %s31_s26   ;;  %s2084_s25 = sphi %s2199_s25, %s2612_s25   ;;  %s2080_s24 = sphi %s2197_s24, %s2611_s24   ;;  %s2076_s23 = sphi %s2195_s23, %s2610_s23   ;;  %s2072_s22 = sphi %s2193_s22, %s2614_s22   ;;  %s2068_s21 = sphi %s2191_s21, %s2613_s21  }
   0xa   : > { %2587 = sst [smem:[#allocation14_spill]] %s2076_s23  ;;  %s1633_s28 = sadd.s32 4294967294, %s2088_s26  }
   0xb   : > { %2588 = sst [smem:[#allocation15_spill]] %s2084_s25  ;;  %s43_s29 = sadd.s32 1, %s2084_s25 }
   0xc   : > { %2589 = sst [smem:[#allocation16_spill]] %s2088_s26  ;;  %s408_s30 = sadd.s32 1, %s2076_s23 }
   0xd   : > { %p45_p0 = scmp.ge.s32.totalorder %s43_s29, 2  ;;  %p418_p1 = scmp.ne.s32.totalorder %s2076_s23, %s2072_s22 }
   0xe   : > { %p419_p2 = scmp.eq.s32.totalorder %s1632_s27, 1  ;;  %p424_p3 = scmp.ne.s32.totalorder %s2072_s22, %s2068_s21 }
   0xf   : > { %s2616_s29 = smov (%p45_p0, %s43_s29), 0  ;;  %p425_p5 = scmp.eq.s32.totalorder %s1633_s28, 1 }
  0x10   : > { %2590 = sst [smem:[#allocation17_spill]] %s2616_s29  ;;  %p2231_p4 = por %p419_p2, %p418_p1 }
  0x11   : > { %s403_s17 = ssub.s32 %s2084_s25, %s2616_s29  ;;  %p1634_p6 = scmp.ge.s32.totalorder %s2088_s26, 1 }
  0x12   : > { %s2591_s0 = scalar_select %p2231_p4, 1, 0 }
  0x13   : > { %p406_p7 = scmp.eq.s32.totalorder %s403_s17, 0  ;;  %p2238_p8 = por %p425_p5, %p424_p3 }
  0x14   : > { %2592 = sst [smem:[#allocation18_spill]] %s2591_s0  ;;  %p432_p9 = scmp.lt.s32.totalorder %s2088_s26, 3 }
  0x15   : > { %s2593_s18 = scalar_select %p2238_p8, 1, 0 }
  0x16   : > { %s2244_s19 = scalar_select %p406_p7, %s2076_s23, %s408_s30  }
  0x17   : > { %2594 = sst [smem:[#allocation19_spill]] %s2593_s18  ;;  %p2246_p10 = pnand %p1634_p6, %p432_p9 }
  0x18   : > { %2595 = sst [smem:[#allocation20_spill]] %s2244_s19  ;;  %p2250_p11 = scmp.eq.s32.totalorder %s1632_s27, 0 }
  0x19   : > { %s2596_s20 = scalar_select %p2246_p10, 1, 0 }
  0x1a   : > { %s2597_s21 = scalar_select %p2250_p11, 1, 0 }
  0x1b   : > { %p1821_p12 = pneg %p2246_p10  ;;  %s2090_s28 = smov [#allocation4]  }
  0x1c   : > { %s466_s17 = sshll.u32 %s2090_s28, 4  ;;  %s2091_s29 = smov [#allocation7]   ;;  %s467_s17 = int_to_ptr.vmem [resolvable:$true] %s466_s17 }
  0x1d   : > { %s480_s25 = sshll.u32 %s2091_s29, 4  ;;  %p2258_p13 = pnand %p2250_p11, %p1821_p12  ;;  %s2262_s25 = int_to_ptr.vmem [resolvable:$true] %s480_s25 }
  0x1e   : > { %s1946_s23 = scalar_lea.hbm %s2557_s4, 128 }
  0x1f   : > { %p1947_p0 = scmp.ne.s32.totalorder %s2557_s4, %s1946_s23  ;;  %p1948_p1 = pneg %p2258_p13 }
  0x20   : > { %p1953_p5 = scmp.lt.u32.totalorder %s1946_s23, %s2557_s4 }
  0x21   : > { %p1949_p2 = pnand %p1948_p1, %p1947_p0 }
  0x23   : > { %p1950_p3 = pneg %p1949_p2 }
  0x25   : > { %p1955_p6 = pnand %p1953_p5, %p1950_p3 }
  0x27   : > { %1958 = shalt.err (!%p1955_p6)
}
  0x28   : > { %s1959_s16 = scalar_lea.vmem %s467_s17, 128  ;;  %p1967_p8 = scmp.lt.s32.totalorder %s467_s17, %s467_s17 }
  0x29   : > { %p1960_p7 = scmp.ne.s32.totalorder %s467_s17, %s1959_s16  ;;  %p1968_p4 = scmp.lt.s32.totalorder %s1959_s16, %s1959_s16 }
  0x2b   : > { %p1962_p9 = pnand %p1960_p7, %p1948_p1  ;;  %p1969_p11 = por %p1968_p4, %p1967_p8 }
  0x2d   : > { %p1963_p12 = pneg %p1962_p9 }
  0x2f   : > { %p1970_p10 = pnand %p1969_p11, %p1963_p12 }
  0x31   : > { %1973 = shalt.err (!%p1970_p10)
}
  0x32   : > { %1824 = dma.hbm_to_vmem [thread:$0]  (!%p2258_p13), %s2557_s4, 128, %s467_s17, [#allocation5]  }
  0x33   : > { %s1974_s27 = scalar_lea.hbm %s2559_s6, 128 }
  0x34   : > { %p1975_p0 = scmp.ne.s32.totalorder %s2559_s6, %s1974_s27  ;;  %p1981_p10 = scmp.lt.u32.totalorder %s1974_s27, %s2559_s6 }
  0x36   : > { %p1977_p4 = pnand %p1975_p0, %p1948_p1 }
  0x38   : > { %p1978_p8 = pneg %p1977_p4 }
  0x3a   : > { %p1983_p11 = pnand %p1981_p10, %p1978_p8 }
  0x3c   : > { %1986 = shalt.err (!%p1983_p11)
}
  0x3d   : > { %s1987_s17 = scalar_lea.vmem %s2262_s25, 128  ;;  %p1995_p6 = scmp.lt.s32.totalorder %s2262_s25, %s2262_s25 }
  0x3e   : > { %p1988_p2 = scmp.ne.s32.totalorder %s2262_s25, %s1987_s17  ;;  %p1996_p7 = scmp.lt.s32.totalorder %s1987_s17, %s1987_s17 }
  0x40   : > { %p1990_p3 = pnand %p1988_p2, %p1948_p1  ;;  %p1997_p9 = por %p1996_p7, %p1995_p6 }
  0x42   : > { %p1991_p5 = pneg %p1990_p3 }
  0x44   : > { %p1998_p12 = pnand %p1997_p9, %p1991_p5 }
  0x46   : > { %2001 = shalt.err (!%p1998_p12)
}
  0x47   : > { %1827 = dma.hbm_to_vmem [thread:$0]  (!%p2258_p13), %s2559_s6, 128, %s2262_s25, [#allocation8]  }
  0x48   : > { %p2599_p0 = scmp.ne.s32.totalorder %s2596_s20, 0 }
  0x49   : > { %p2600_p4 = scmp.ne.s32.totalorder (!%p2599_p0), %s2597_s21, 0 }
  0x4a   : > { %527 = sbr.rel (%p2599_p0) target bundleno = 2416 (0x970), region = 84 }
  0x51   : > { %2055 = dma.done.wait (%p2600_p4), [#allocation5], 128  }
  0x52   : > { %2057 = vsyncadd (%p2600_p4), [#allocation5], 4294967168 }
  0x53   : > { %2059 = dma.done.wait (%p2600_p4), [#allocation8], 128  }
  0x54   : > { %2061 = vsyncadd (%p2600_p4), [#allocation8], 4294967168  ;;  %p592_p1 = scmp.lt.s32.totalorder %s2080_s24, 1  ;;  %s2601_s23 = sld [smem:[#allocation21_spill]]  ;;  %vm616_vm0 = vcmask 261120   ;;  %v1900_v3 = vld [vmem:[%s2563_s10] sm:$0xff]  }
  0x55   : > { %v2092_v4 = vmov 0.0   ;;  %v1901_v5 = vld [vmem:[%s2563_s10 + $0x8] sm:$0xff]   ;;  %vm2093_vm1 = vmmov 0   ;;  %v1646_v13 = vld [vmem:[%s2560_s7] ss:$0 sm:$0xff]  ;;  %vm774_vm2 = vcmask 125952  }
  0x56   : > { %s593_s30 = scalar_select %p592_p1, %s2080_s24, 1  ;;  %1719 = vmatprep.subr.bf16.mxu1 %v2092_v4  ;;  %1749 = vmatprep.subr.bf16.mxu0 %v2092_v4  ;;  %v1902_v16 = vld [vmem:[%s2564_s11] sm:$0xff]   ;;  %v1903_v19 = vld [vmem:[%s2564_s11 + $0x8] sm:$0xff]   ;;  %vm870_vm3 = vcmask 228352   ;;  %vm769_vm4 = vcmask 31744   ;;  %vm759_vm5 = vcmask 97280  }
  0x57   : > { %1720 = vmatpush3.bf16.msra.mxu1 %v1900_v3  ;;  %1723 = vmatprep.mubr.msk.bf16.mxu1 %vm2093_vm1, %v2092_v4  ;;  %v1904_v21 = vld [vmem:[%s2562_s9] sm:$0xff]   ;;  %v1905_v23 = vld [vmem:[%s2562_s9 + $0x8] sm:$0xff]   ;;  %s2094_s21 = smov 100   ;;  %s2095_s27 = smov 124   ;;  %v750_v61 = vld [vmem:[#allocation7] sm:$0xff]  ;;  %vm904_vm6 = vcmask 64512  }
  0x58   : > { %s1645_s25 = sshll.u32 %s593_s30, 3  ;;  %1721 = vmatprep.subr.bf16.mxu1 %v2092_v4  ;;  %1751 = vmatprep.mubr.msk.bf16.mxu0 %vm2093_vm1, %v2092_v4  ;;  %s2096_s29 = smov 28   ;;  %v860_v39 = vld [vmem:[%s2555_s2] sm:$0xff]  ;;  %v748_v59 = vld [vmem:[#allocation4] sm:$0xff]  ;;  %vm891_vm7 = vcmask 1043456   ;;  %vm1168_vm9 = vcmask 130048  }
  0x59   : > { %s2097_s28 = smov 4   ;;  %s2098_s16 = smov 12   ;;  %v859_v41 = vld [vmem:[%s2554_s1] sm:$0xff]  ;;  %vm1170_vm10 = vcmask 195584  }
  0x5a   : > { %s595_s19 = scalar_lea.vmem %s2601_s23, %s1645_s25  ;;  %s2099_s17 = smov 116   ;;  %v861_v44 = vld [vmem:[%s2556_s3] sm:$0xff] }
  0x5b   : > { %v2326_v0 = vld [vmem:[%s595_s19] sm:$0xff]  ;;  %1722 = vmatpush3.bf16.msra.mxu1 %v1901_v5  ;;  %s2100_s23 = smov 120   ;;  %s2103_s26 = smov 16  }
  0x5c   : > { %v615_v1 = vmul.f32 %v2326_v0, %v2326_v0  ;;  %1727 = vmatprep.subr.bf16.mxu1 %v2092_v4  ;;  %v749_v56 = vld [vmem:[%s2558_s5] sm:$0xff]  ;;  %s2104_s30 = smov 24   ;;  %s1681_s18 = sshll.u32 %s2080_s24, 7 }
  0x5e   : > { %v617_v2 = vsel %vm616_vm0, %v615_v1, 0.0 }
  0x5f   : > { %618 = vadd.xlane.f32.xlu0 %v617_v2 }
  0x63   : > { %785 = vadd.xlane.f32.xlu0 %v617_v2 }
  0xec   : > { %v619_v6 = vpop.xlane.xlu0 %618 }
  0xed   : > { %v621_v7 = vmul.f32 0.03125, %v619_v6 }
  0xef   : > { %v622_v8 = vadd.f32 1e-05, %v621_v7 }
  0xf0   : > { %v786_v9 = vpop.xlane.xlu0 %785 }
  0xf1   : > { %1920 = vrsqrt.f32 %v622_v8  ;;  %v788_v10 = vmul.f32 0.03125, %v786_v9 }
  0xf3   : > { %v789_v11 = vadd.f32 1e-05, %v788_v10 }
  0xf5   : > { %1922 = vrsqrt.f32 %v789_v11 }
  0xfb   : > { %v1921_v12 = vpop.eup %1920 }
  0xfc   : > { %v624_v14 = vmul.f32 %v1921_v12, %v2326_v0 }
  0xfe   : > { %v631_v15 = vmul.f32 %v1646_v13, %v624_v14 }
  0xff   : > { %v1923_v18 = vpop.eup %1922 }
 0x100   : > { %v632_v17 = vpack.c.bf16 %v631_v15, %v631_v15  ;;  %v791_v20 = vmul.f32 %v1923_v18, %v2326_v0 }
 0x102   : > { %1724 = vmatmul.mubr.msk.bf16.vlgmr.msra.gmra.mrb[0].mxu1 %vm616_vm0, %v632_v17  ;;  %v798_v22 = vmul.f32 %v1646_v13, %v791_v20 }
 0x103   : > { %1728 = vmatpush3.bf16.msra.mxu1 %v1902_v16  ;;  %1731 = vmatprep.mubr.msk.bf16.mxu1 %vm2093_vm1, %v2092_v4  ;;  %v1002_v16 = vlaneseq }
 0x104   : > { %1729 = vmatprep.subr.bf16.mxu1 %v2092_v4  ;;  %v799_v24 = vpack.c.bf16 %v798_v22, %v798_v22 }
 0x105   : > { %v1005_v18 = vand.u32 127, %v1002_v16 }
 0x107   : > { %1730 = vmatpush3.bf16.msra.mxu1 %v1903_v19 }
 0x108   : > { %1735 = vmatprep.subr.bf16.mxu1 %v2092_v4 }
 0x10a   : > { %1732 = vmatmul.mubr.msk.bf16.vlgmr.msra.gmra.mrb[4].mxu1 %vm616_vm0, %v632_v17  ;;  %v1003_v17 = vshrl.u32 %v1002_v16, 7 }
 0x10b   : > { %1736 = vmatpush3.bf16.msra.mxu1 %v1904_v21  ;;  %1739 = vmatprep.mubr.msk.bf16.mxu1 %vm2093_vm1, %v2092_v4 }
 0x10c   : > { %1737 = vmatprep.subr.bf16.mxu1 %v2092_v4  ;;  %vm1008_vm8 = vcmp.gt.s32.totalorder %v1005_v18, %v1003_v17 }
 0x10f   : > { %1738 = vmatpush3.bf16.msra.mxu1 %v1905_v23 }
 0x110   : > { %1743 = vmatprep.subr.bf16.mxu1 %v2092_v4 }
 0x112   : > { %1740 = vmatmul.mubr.msk.bf16.vlgmr.msra.gmra.mrb[8].mxu1 %vm616_vm0, %v799_v24 }
 0x113   : > { %1745 = vmatprep.mubr.msk.bf16.mxu1 %vm2093_vm1, %v2092_v4 }
 0x1d5   : > { %v686_v25 = vpop.f32.mrb[0].mxu1 }
 0x1d6   : > { %v1725_v26 = vpop.f32.mrb[1].mxu1  ;;  %v751_v62 = vmul.f32 %v748_v59, %v686_v25 }
 0x1d7   : > { %v689_v27 = vpop.f32.mrb[2].mxu1 }
 0x1d8   : > { %v1726_v28 = vpop.f32.mrb[3].mxu1 }
 0x1dd   : > { %v742_v29 = vpop.f32.mrb[4].mxu1 }
 0x1de   : > { %v776_v30 = vpack.c.bf16 %v742_v29, %v742_v29  ;;  %v1733_v31 = vpop.f32.mrb[5].mxu1 }
 0x1df   : > { %v745_v32 = vpop.f32.mrb[6].mxu1 }
 0x1e0   : > { %777 = vst.msk [vmem:[#allocation3] sm:$0xf] %vm774_vm2, %v776_v30  ;;  %v1734_v33 = vpop.f32.mrb[7].mxu1 }
 0x1e5   : > { %v853_v34 = vpop.f32.mrb[8].mxu1 }
 0x1e6   : > { %874 = vrot.lane.b32.xlu0 %v853_v34, %s2094_s21  ;;  %864 = vrot.lane.b32.xlu1 %v853_v34, %s2095_s27  ;;  %v1741_v35 = vpop.f32.mrb[9].mxu1  ;;  %v862_v46 = vmul.f32 %v859_v41, %v853_v34 }
 0x1e7   : > { %v856_v36 = vpop.f32.mrb[10].mxu1  ;;  %v886_v9 = vld [vmem:[#allocation3] sm:$0xf] }
 0x1e8   : > { %v1742_v37 = vpop.f32.mrb[11].mxu1  ;;  %v1057_v12 = vsel %vm891_vm7, %v886_v9, 0 }
 0x1ea   : > { %867 = vrot.lane.b32.xlu1 %v853_v34, %s2096_s29 }
 0x1ee   : > { %877 = vrot.lane.b32.xlu1 %v853_v34, %s2097_s28 }
 0x1f2   : > { %753 = vrot.lane.b32.xlu1 %v686_v25, %s2095_s27  ;;  %s2101_s27 = smov 112  }
 0x1f6   : > { %756 = vrot.lane.b32.xlu1 %v686_v25, %s2098_s16  ;;  %s2102_s16 = smov 8  }
 0x1fa   : > { %763 = vrot.lane.b32.xlu1 %v686_v25, %s2099_s17 }
 0x1fe   : > { %766 = vrot.lane.b32.xlu1 %v686_v25, %s2097_s28 }
 0x258   : > { %v865_v38 = vpop.permute.xlu1 %864  ;;  %v875_v45 = vpop.permute.xlu0 %874 }
 0x25c   : > { %v868_v40 = vpop.permute.xlu1 %867 }
 0x25d   : > { %v871_v42 = vsel %vm870_vm3, %v865_v38, %v868_v40 }
 0x25e   : > { %v872_v43 = vmul.f32 %v871_v42, %v860_v39 }
 0x260   : > { %v878_v47 = vpop.permute.xlu1 %877  ;;  %v873_v49 = vadd.f32 %v872_v43, %v862_v46 }
 0x261   : > { %v881_v48 = vsel %vm769_vm4, %v875_v45, %v878_v47 }
 0x262   : > { %v882_v50 = vmul.f32 %v881_v48, %v861_v44 }
 0x264   : > { %v883_v51 = vadd.f32 %v882_v50, %v873_v49  ;;  %v754_v52 = vpop.permute.xlu1 %753 }
 0x266   : > { %v884_v53 = vpack.c.bf16 %v883_v51, %v883_v51 }
 0x268   : > { %v757_v54 = vpop.permute.xlu1 %756  ;;  %v888_v55 = vrot.slane %v884_v53, 4 }
 0x269   : > { %v760_v57 = vsel %vm759_vm5, %v754_v52, %v757_v54 }
 0x26a   : > { %889 = vrot.lane.b32.xlu1 %v888_v55, %s2100_s23  ;;  %v761_v60 = vmul.f32 %v760_v57, %v749_v56 }
 0x26c   : > { %v764_v58 = vpop.permute.xlu1 %763  ;;  %v762_v2 = vadd.f32 %v761_v60, %v751_v62 }
 0x270   : > { %v767_v63 = vpop.permute.xlu1 %766 }
 0x271   : > { %v770_v1 = vsel %vm769_vm4, %v764_v58, %v767_v63 }
 0x272   : > { %v771_v3 = vmul.f32 %v770_v1, %v750_v61  ;;  %v1906_v1 = vld [vmem:[%s2565_s12] sm:$0xff]  }
 0x274   : > { %v772_v5 = vadd.f32 %v771_v3, %v762_v2 }
 0x276   : > { %v773_v6 = vpack.c.bf16 %v772_v5, %v772_v5 }
 0x278   : > { %775 = vst.msk [vmem:[#allocation2] sm:$0xf] %vm774_vm2, %v773_v6 }
 0x27f   : > { %v885_v7 = vld [vmem:[#allocation2] sm:$0xf] }
 0x280   : > { %899 = vrot.lane.b32.xlu0 %v885_v7, %s2100_s23  ;;  %v908_v8 = vsel %vm904_vm6, %v885_v7, 0 }
 0x281   : > { %1744 = vmatpush3.bf16.xpose.msra.mxu1 %v908_v8 }
 0x282   : > { %1755 = vmatprep.subr.bf16.mxu1 %v2092_v4 }
 0x2dc   : > { %v890_v10 = vpop.permute.xlu1 %889 }
 0x2dd   : > { %v894_v11 = vsel %vm891_vm7, %v884_v53, %v890_v10  ;;  %v1907_v10 = vld [vmem:[%s2565_s12 + $0x8] sm:$0xff]  }
 0x2de   : > { %896 = vrot.lane.b32.xlu1 %v894_v11, %s2101_s27  ;;  %1746 = vmatmul.mubr.msk.bf16.vlgmr.msra.gmra.mrb[12].mxu1 %vm904_vm6, %v894_v11  ;;  %s2603_s27 = sld [smem:[#allocation22_spill]] }
 0x2df   : > { %1756 = vmatpush3.bf16.msra.mxu1 %v1057_v12  ;;  %1757 = vmatprep.mubr.msk.bf16.mxu1 %vm2093_vm1, %v2092_v4 }
 0x2e0   : > { %1767 = vmatprep.subr.bf16.mxu1 %v2092_v4 }
 0x2e4   : > { %s2505_s29 = scalar_lea.hbm %s2603_s27, %s1681_s18 }
 0x2f2   : > { %v900_v13 = vpop.permute.xlu0 %899 }
 0x2f3   : > { %v955_v14 = vsel %vm904_vm6, %v900_v13, 0 }
 0x2f4   : > { %1750 = vmatpush3.bf16.xpose.msra.mxu0 %v955_v14 }
 0x2f5   : > { %1761 = vmatprep.subr.bf16.mxu0 %v2092_v4 }
 0x350   : > { %v897_v15 = vpop.permute.xlu1 %896 }
 0x351   : > { %1752 = vmatmul.mubr.msk.bf16.vlgmr.msra.gmra.mrb[0].mxu0 %vm904_vm6, %v897_v15 }
 0x352   : > { %1763 = vmatprep.mubr.msk.bf16.mxu0 %vm2093_vm1, %v2092_v4 }
 0x3b1   : > { %v944_v19 = vpop.f32.mrb[12].mxu1 }
 0x3b2   : > { %v998_v20 = vmul.f32 0.35355338, %v944_v19  ;;  %v1747_v21 = vpop.f32.mrb[13].mxu1 }
 0x3b3   : > { %v947_v22 = vpop.f32.mrb[14].mxu1 }
 0x3b4   : > { %v999_v23 = vmul.f32 0.35355338, %v947_v22  ;;  %v1748_v24 = vpop.f32.mrb[15].mxu1  ;;  %v1011_v25 = vsel %vm1008_vm8, -inf, %v998_v20 }
 0x3b5   : > { %v1015_v26 = vsel %vm904_vm6, %v1011_v25, -inf }
 0x3b6   : > { %1016 = vmax.xlane.f32.xlu0 %v1015_v26  ;;  %v1012_v27 = vsel %vm1008_vm8, -inf, %v999_v23 }
 0x3b7   : > { %v1018_v28 = vsel %vm904_vm6, %v1012_v27, -inf }
 0x3b8   : > { %1019 = vmax.xlane.f32.xlu1 %v1018_v28 }
 0x3c9   : > { %902 = vrot.lane.b32.xlu1 %v886_v9, %s2100_s23 }
 0x424   : > { %v991_v29 = vpop.f32.mrb[0].mxu0 }
 0x425   : > { %v1000_v30 = vmul.f32 0.35355338, %v991_v29  ;;  %v1753_v31 = vpop.f32.mrb[1].mxu0 }
 0x426   : > { %v994_v32 = vpop.f32.mrb[2].mxu0 }
 0x427   : > { %v1001_v33 = vmul.f32 0.35355338, %v994_v32  ;;  %v1754_v34 = vpop.f32.mrb[3].mxu0  ;;  %v1013_v35 = vsel %vm1008_vm8, -inf, %v1000_v30 }
 0x428   : > { %v1021_v36 = vsel %vm904_vm6, %v1013_v35, -inf }
 0x429   : > { %1022 = vmax.xlane.f32.xlu0 %v1021_v36  ;;  %v1014_v37 = vsel %vm1008_vm8, -inf, %v1001_v33 }
 0x42a   : > { %v1024_v38 = vsel %vm904_vm6, %v1014_v37, -inf }
 0x42d   : > { %1025 = vmax.xlane.f32.xlu0 %v1024_v38  ;;  %v1909_v38 = vld [vmem:[%s2567_s14] sm:$0xff]  }
 0x443   : > { %v1017_v39 = vpop.xlane.xlu0 %1016 }
 0x444   : > { %v1027_v40 = vsub.f32 %v1011_v25, %v1017_v39  ;;  %v1911_v39 = vld [vmem:[%s2567_s14 + $0x8] sm:$0xff]  }
 0x445   : > { %v1020_v41 = vpop.xlane.xlu1 %1019 }
 0x446   : > { %v1031_v42 = vmul.f32 1.442695, %v1027_v40  ;;  %v1028_v43 = vsub.f32 %v1012_v27, %v1020_v41 }
 0x448   : > { %v1033_v44 = vmul.f32 1.442695, %v1028_v43  ;;  %1924 = vpow2.f32 %v1031_v42 }
 0x449   : > { %v903_v45 = vpop.permute.xlu1 %902 }
 0x44a   : > { %1926 = vpow2.f32 %v1033_v44  ;;  %v1104_v46 = vsel %vm891_vm7, %v903_v45, 0  ;;  %v1664_v44 = vld [vmem:[%s2561_s8] ss:$0 sm:$0xff] }
 0x44b   : > { %1762 = vmatpush3.bf16.msra.mxu0 %v1104_v46 }
 0x44c   : > { %1775 = vmatprep.subr.bf16.mxu0 %v2092_v4 }
 0x452   : > { %v1925_v47 = vpop.eup %1924 }
 0x453   : > { %v1039_v62 = vsel %vm904_vm6, %v1925_v47, 0.0 }
 0x454   : > { %v1927_v48 = vpop.eup %1926 }
 0x455   : > { %v1042_v49 = vsel %vm904_vm6, %v1927_v48, 0.0  ;;  %v1051_v50 = vpack.c.bf16 %v1927_v48, %v1925_v47  ;;  %v1912_v48 = vld [vmem:[%s2568_s15] sm:$0xff]  }
 0x456   : > { %1043 = vadd.xlane.f32.xlu0 %v1042_v49  ;;  %v1913_v49 = vld [vmem:[%s2568_s15 + $0x8] sm:$0xff]  }
 0x457   : > { %1758 = vmatmul.mubr.msk.bf16.vlgmr.msra.gmra.mrb[16].mxu1 %vm904_vm6, %v1051_v50  ;;  %v1914_v50 = vld [vmem:[%s2568_s15 + $0x10] sm:$0xff]  }
 0x458   : > { %1771 = vmatprep.mubr.msk.bf16.mxu1 %vm2093_vm1, %v2092_v4  ;;  %1768 = vmatpush3.bf16.msra.mxu1 %v1906_v1 }
 0x459   : > { %1769 = vmatprep.subr.bf16.mxu1 %v2092_v4 }
 0x45c   : > { %1770 = vmatpush3.bf16.msra.mxu1 %v1907_v10 }
 0x45d   : > { %1783 = vmatprep.subr.bf16.mxu1 %v2092_v4 }
 0x4b6   : > { %v1023_v51 = vpop.xlane.xlu0 %1022 }
 0x4b7   : > { %v1029_v52 = vsub.f32 %v1013_v35, %v1023_v51  ;;  %v1915_v51 = vld [vmem:[%s2568_s15 + $0x18] sm:$0xff]  }
 0x4b9   : > { %v1035_v53 = vmul.f32 1.442695, %v1029_v52  ;;  %v1916_v52 = vld [vmem:[%s2568_s15 + $0x20] sm:$0xff]  }
 0x4ba   : > { %v1026_v54 = vpop.xlane.xlu0 %1025 }
 0x4bb   : > { %1928 = vpow2.f32 %v1035_v53  ;;  %v1030_v55 = vsub.f32 %v1014_v37, %v1026_v54  ;;  %v1908_v37 = vld [vmem:[%s2566_s13] sm:$0xff]   ;;  %v1917_v53 = vld [vmem:[%s2568_s15 + $0x28] sm:$0xff]   ;;  %v1918_v54 = vld [vmem:[%s2568_s15 + $0x30] sm:$0xff]  }
 0x4bd   : > { %v1037_v56 = vmul.f32 1.442695, %v1030_v55  ;;  %v1919_v55 = vld [vmem:[%s2568_s15 + $0x38] sm:$0xff]  }
 0x4bf   : > { %1930 = vpow2.f32 %v1037_v56 }
 0x4c5   : > { %v1929_v57 = vpop.eup %1928 }
 0x4c6   : > { %v1045_v58 = vsel %vm904_vm6, %v1929_v57, 0.0 }
 0x4c7   : > { %1046 = vadd.xlane.f32.xlu0 %v1045_v58 }
 0x4c9   : > { %v1931_v59 = vpop.eup %1930 }
 0x4ca   : > { %v1048_v60 = vsel %vm904_vm6, %v1931_v59, 0.0  ;;  %v1052_v61 = vpack.c.bf16 %v1931_v59, %v1929_v57 }
 0x4cb   : > { %1049 = vadd.xlane.f32.xlu0 %v1048_v60 }
 0x4cc   : > { %1764 = vmatmul.mubr.msk.bf16.vlgmr.msra.gmra.mrb[4].mxu0 %vm904_vm6, %v1052_v61 }
 0x4cd   : > { %1779 = vmatprep.mubr.msk.bf16.mxu0 %vm2093_vm1, %v2092_v4  ;;  %1776 = vmatpush3.bf16.msra.mxu0 %v1908_v37 }
 0x4ce   : > { %1777 = vmatprep.subr.bf16.mxu0 %v2092_v4 }
 0x4cf   : > { %1040 = vadd.xlane.f32.xlu0 %v1039_v62 }
 0x4e3   : > { %v1044_v63 = vpop.xlane.xlu0 %1043 }
 0x4e4   : > { %1932 = vrcp.f32 %v1044_v63 }
 0x4ee   : > { %v1933_v5 = vpop.eup %1932 }
 0x52a   : > { %v1093_v2 = vpop.f32.mrb[16].mxu1 }
 0x52b   : > { %v1759_v3 = vpop.f32.mrb[17].mxu1 }
 0x52c   : > { %v1096_v6 = vpop.f32.mrb[18].mxu1 }
 0x52d   : > { %v1152_v7 = vmul.f32 %v1933_v5, %v1096_v6  ;;  %v1760_v8 = vpop.f32.mrb[19].mxu1 }
 0x52f   : > { %1156 = vrot.lane.b32.xlu0 %v1152_v7, %s2102_s16  ;;  %s2105_s16 = smov [#allocation9]  }
 0x530   : > { %s2006_s17 = sshll.u32 %s2105_s16, 4  ;;  %s2007_s17 = int_to_ptr.vmem [resolvable:$false] %s2006_s17 }
 0x531   : > { %s2008_s0 = scalar_lea.vmem %s2007_s17, 256 }
 0x554   : > { %v1047_v9 = vpop.xlane.xlu0 %1046 }
 0x555   : > { %1934 = vrcp.f32 %v1047_v9 }
 0x558   : > { %v1050_v11 = vpop.xlane.xlu0 %1049 }
 0x559   : > { %1936 = vrcp.f32 %v1050_v11 }
 0x55c   : > { %v1041_v20 = vpop.xlane.xlu0 %1040 }
 0x55d   : > { %1938 = vrcp.f32 %v1041_v20 }
 0x55f   : > { %v1935_v12 = vpop.eup %1934 }
 0x563   : > { %v1937_v18 = vpop.eup %1936 }
 0x567   : > { %v1939_v21 = vpop.eup %1938 }
 0x568   : > { %v1151_v24 = vmul.f32 %v1939_v21, %v1093_v2 }
 0x59f   : > { %v1140_v13 = vpop.f32.mrb[4].mxu0 }
 0x5a0   : > { %v1153_v14 = vmul.f32 %v1935_v12, %v1140_v13  ;;  %v1765_v15 = vpop.f32.mrb[5].mxu0 }
 0x5a1   : > { %v1143_v16 = vpop.f32.mrb[6].mxu0  ;;  %v1157_v22 = vpop.permute.xlu0 %1156 }
 0x5a2   : > { %1160 = vrot.lane.b32.xlu1 %v1153_v14, %s2103_s26  ;;  %v1766_v17 = vpop.f32.mrb[7].mxu0  ;;  %v1154_v19 = vmul.f32 %v1937_v18, %v1143_v16  ;;  %v1167_v25 = vsel %vm904_vm6, %v1151_v24, %v1157_v22  ;;  %s589_s26 = sand.u32 1, %s2072_s22  }
 0x5a3   : > { %s1644_s25 = sshll.u32 %s589_s26, 3  ;;  %s1481_s24 = scalar_lea.sflag [#allocation6], %s589_s26 }
 0x5a4   : > { %s591_s20 = scalar_lea.vmem [#allocation9], %s1644_s25 }
 0x5a5   : > { %s1495_s23 = sshll.u32 %s591_s20, 4  ;;  %s2507_s23 = int_to_ptr.vmem [resolvable:$true] %s1495_s23 }
 0x5a6   : > { %1164 = vrot.lane.b32.xlu1 %v1154_v19, %s2104_s30  ;;  %s2602_s30 = sld [smem:[#allocation18_spill]]  ;;  %s2002_s28 = scalar_lea.vmem %s2507_s23, 128 }
 0x5a7   : > { %p2003_p13 = scmp.ne.s32.totalorder %s2507_s23, %s2002_s28  ;;  %p2009_p2 = scmp.lt.s32.totalorder %s2507_s23, %s2007_s17 }
 0x5a8   : > { %p2010_p3 = scmp.lt.s32.totalorder %s2008_s0, %s2002_s28 }
 0x5aa   : > { %p2011_p5 = por %p2010_p3, %p2009_p2 }
 0x5ac   : > { %p2604_p8 = scmp.ne.s32.totalorder %s2602_s30, 0 }
 0x5ae   : > { %p2004_p10 = pnand %p2003_p13, %p2604_p8 }
 0x5b0   : > { %p2005_p11 = pneg %p2004_p10 }
 0x5b2   : > { %p2012_p6 = pnand %p2011_p5, %p2005_p11 }
 0x614   : > { %v1161_v23 = vpop.permute.xlu1 %1160 }
 0x615   : > { %v1169_v26 = vsel %vm1168_vm9, %v1167_v25, %v1161_v23 }
 0x618   : > { %v1165_v27 = vpop.permute.xlu1 %1164 }
 0x619   : > { %v1171_v28 = vsel %vm1170_vm10, %v1169_v26, %v1165_v27 }
 0x61a   : > { %v1172_v29 = vpack.c.bf16 %v1171_v28, %v1171_v28 }
 0x61c   : > { %1772 = vmatmul.mubr.msk.bf16.vlgmr.msra.gmra.mrb[20].mxu1 %vm616_vm0, %v1172_v29 }
 0x61d   : > { %1787 = vmatprep.mubr.msk.bf16.mxu1 %vm2093_vm1, %v2092_v4  ;;  %1784 = vmatpush3.bf16.msra.mxu1 %v1909_v38 }
 0x61e   : > { %1785 = vmatprep.subr.bf16.mxu1 %v2092_v4 }
 0x621   : > { %1786 = vmatpush3.bf16.msra.mxu1 %v1911_v39 }
 0x6ef   : > { %v1226_v30 = vpop.f32.mrb[20].mxu1 }
 0x6f0   : > { %v2440_v31 = vadd.f32 %v1226_v30, %v2326_v0  ;;  %v1773_v32 = vpop.f32.mrb[21].mxu1  ;;  %v1910_v0 = vld [vmem:[%s2566_s13 + $0x8] sm:$0xff]  }
 0x6f1   : > { %v1229_v33 = vpop.f32.mrb[22].mxu1  ;;  %1778 = vmatpush3.bf16.msra.mxu0 %v1910_v0 }
 0x6f2   : > { %v1774_v34 = vpop.f32.mrb[23].mxu1  ;;  %v1234_v35 = vmul.f32 %v2440_v31, %v2440_v31  ;;  %1791 = vmatprep.subr.bf16.mxu0 %v2092_v4 }
 0x6f4   : > { %v1235_v36 = vsel %vm616_vm0, %v1234_v35, 0.0 }
 0x6f5   : > { %1236 = vadd.xlane.f32.xlu1 %v1235_v36 }
 0x782   : > { %v1237_v40 = vpop.xlane.xlu1 %1236 }
 0x783   : > { %v1238_v41 = vmul.f32 0.03125, %v1237_v40 }
 0x785   : > { %v1239_v42 = vadd.f32 1e-05, %v1238_v41 }
 0x787   : > { %1940 = vrsqrt.f32 %v1239_v42 }
 0x791   : > { %v1941_v43 = vpop.eup %1940 }
 0x792   : > { %v1241_v45 = vmul.f32 %v1941_v43, %v2440_v31 }
 0x794   : > { %v1248_v46 = vmul.f32 %v1664_v44, %v1241_v45 }
 0x796   : > { %v1249_v47 = vpack.c.bf16 %v1248_v46, %v1248_v46 }
 0x798   : > { %1780 = vmatmul.mubr.msk.bf16.vlgmr.msra.gmra.mrb[8].mxu0 %vm616_vm0, %v1249_v47  ;;  %1788 = vmatmul.mubr.msk.bf16.vlgmr.msra.gmra.mrb[24].mxu1 %vm616_vm0, %v1249_v47 }
 0x799   : > { %1807 = vmatprep.mubr.msk.bf16.mxu0 %vm2093_vm1, %v2092_v4  ;;  %1792 = vmatpush3.bf16.msra.mxu0 %v1912_v48 }
 0x79a   : > { %1793 = vmatprep.subr.bf16.mxu0 %v2092_v4 }
 0x79d   : > { %1794 = vmatpush3.bf16.msra.mxu0 %v1913_v49 }
 0x79e   : > { %1795 = vmatprep.subr.bf16.mxu0 %v2092_v4 }
 0x7a1   : > { %1796 = vmatpush3.bf16.msra.mxu0 %v1914_v50 }
 0x7a2   : > { %1797 = vmatprep.subr.bf16.mxu0 %v2092_v4 }
 0x7a5   : > { %1798 = vmatpush3.bf16.msra.mxu0 %v1915_v51 }
 0x7a6   : > { %1799 = vmatprep.subr.bf16.mxu0 %v2092_v4 }
 0x7a9   : > { %1800 = vmatpush3.bf16.msra.mxu0 %v1916_v52 }
 0x7aa   : > { %1801 = vmatprep.subr.bf16.mxu0 %v2092_v4 }
 0x7ad   : > { %1802 = vmatpush3.bf16.msra.mxu0 %v1917_v53 }
 0x7ae   : > { %1803 = vmatprep.subr.bf16.mxu0 %v2092_v4 }
 0x7b1   : > { %1804 = vmatpush3.bf16.msra.mxu0 %v1918_v54 }
 0x7b2   : > { %1805 = vmatprep.subr.bf16.mxu0 %v2092_v4 }
 0x7b5   : > { %1806 = vmatpush3.bf16.msra.mxu0 %v1919_v55 }
 0x86b   : > { %v1303_v56 = vpop.f32.mrb[8].mxu0  ;;  %v1359_v57 = vpop.f32.mrb[24].mxu1 }
 0x86c   : > { %v1671_v58 = vmul.f32 -1.442695, %v1303_v56  ;;  %v1781_v59 = vpop.f32.mrb[9].mxu0  ;;  %v1789_v60 = vpop.f32.mrb[25].mxu1 }
 0x86d   : > { %v1306_v61 = vpop.f32.mrb[10].mxu0  ;;  %v1362_v62 = vpop.f32.mrb[26].mxu1 }
 0x86e   : > { %1942 = vpow2.f32 %v1671_v58  ;;  %v1782_v63 = vpop.f32.mrb[11].mxu0  ;;  %v1790_v1 = vpop.f32.mrb[27].mxu1 }
 0x878   : > { %v1943_v2 = vpop.eup %1942 }
 0x879   : > { %v1368_v3 = vadd.f32 1.0, %v1943_v2 }
 0x87b   : > { %1944 = vrcp.f32 %v1368_v3 }
 0x885   : > { %v1945_v4 = vpop.eup %1944 }
 0x886   : > { %v1371_v5 = vmul.f32 %v1945_v4, %v1303_v56 }
 0x888   : > { %v1372_v6 = vmul.f32 %v1371_v5, %v1359_v57 }
 0x88a   : > { %v1373_v7 = vpack.c.bf16 %v1372_v6, %v1372_v6 }
 0x88c   : > { %1808 = vmatmul.mubr.bf16.vlgmr.msra.gmra.mrb[12].mxu0 %v1373_v7 }
 0x95f   : > { %v1472_v8 = vpop.f32.mrb[12].mxu0 }
 0x960   : > { %v1478_v9 = vadd.f32 %v1472_v8, %v2440_v31  ;;  %v1809_v10 = vpop.f32.mrb[13].mxu0 }
 0x961   : > { %v1475_v11 = vpop.f32.mrb[14].mxu0 }
 0x962   : > { %v1810_v12 = vpop.f32.mrb[15].mxu0  ;;  %1479 = vst.msk [vmem:[%s591_s20] sm:$0xff] %vm616_vm0, %v1478_v9 }
 0x963   : > { %2015 = shalt.err (!%p2012_p6)
}
 0x964   : > { %s2016_s26 = scalar_lea.hbm %s2505_s29, 128  ;;  %s2020_s20 = scalar_lea.hbm %s2603_s27, 256 }
 0x965   : > { %p2017_p7 = scmp.ne.s32.totalorder %s2505_s29, %s2016_s26  ;;  %p2021_p0 = scmp.lt.u32.totalorder %s2505_s29, %s2603_s27 }
 0x966   : > { %p2022_p4 = scmp.lt.u32.totalorder %s2020_s20, %s2016_s26  ;;  %p2024_p13 = scmp.lt.u32.totalorder %s2016_s26, %s2505_s29 }
 0x967   : > { %p2018_p9 = pnand %p2017_p7, %p2604_p8 }
 0x968   : > { %p2023_p1 = por %p2022_p4, %p2021_p0 }
 0x969   : > { %p2019_p12 = pneg %p2018_p9 }
 0x96a   : > { %p2025_p10 = por %p2024_p13, %p2023_p1 }
 0x96c   : > { %p2026_p11 = pnand %p2025_p10, %p2019_p12 }
 0x96e   : > { %2029 = shalt.err (!%p2026_p11)
}
 0x96f   : > { %1819 = dma.vmem_to_hbm [thread:$0]  (%p2604_p8), %s2507_s23, 128, %s2505_s29, %s1481_s24  }
 0x970 PF: > { %s2605_s28 = sld [smem:[#allocation16_spill]]  ;;  %s2606_s16 = sld [smem:[#allocation13_spill]] }
 0x971   : > { %s2607_s17 = sld [smem:[#allocation19_spill]] }
 0x976   : > { %p1836_p2 = scmp.ge.s32.totalorder %s2605_s28, 2  ;;  %s1507_s0 = sand.u32 1, %s2606_s16  }
 0x977   : > { %p2608_p3 = scmp.ne.s32.totalorder %s2607_s17, 0  ;;  %s1508_s25 = scalar_lea.sflag [#allocation6], %s1507_s0 }
 0x979   : > { %p1829_p5 = pnand %p1836_p2, %p2608_p3 }
 0x97b   : > { %2063 = dma.done.wait (!%p1829_p5), %s1508_s25, 128  }
 0x97c   : > { %2065 = vsyncadd (!%p1829_p5), %s1508_s25, 4294967168  ;;  %s31_s26 = sadd.s32 1, %s2605_s28   ;;  %s2609_s18 = sld [smem:[#allocation14_spill]] }
 0x97d   : > { %p28_p6 = scmp.ge.s32.totalorder %s31_s26, 4   ;;  %s2610_s23 = sld [smem:[#allocation20_spill]] }
 0x97e   : > { %s2611_s24 = sld [smem:[#allocation15_spill]]  ;;  %s2612_s25 = sld [smem:[#allocation17_spill]] }
 0x97f   : > { %s2613_s21 = smov %s2072_s22  ;;  %30 = sbr.rel (!%p28_p6) target bundleno = 9 (0x9), region = 142 }
 0x982   : > { %s2614_s22 = smov %s2609_s18 }
 0x986   :  { %1513 = vsyncpa [#allocation5], 1 }
 0x987   :  { %1515 = vsyncpa [#allocation5 + $0x1], 1 }
 0x988   :  { %1516 = vsyncpa [#allocation8], 1 }
 0x989   :  { %1517 = vsyncpa [#allocation6], 1 }
 0x98a   :  { %1519 = vsyncpa [#allocation6 + $0x1], 1 }

// kernel: tpu_custom_call.1
= control target key start
LH: loop header
LB: loop body
LE: loop exit
PB: predicated region body
PF: predicated region fallthrough
CT: control target
= control target key end

     0   :  { %s2553_s0 = inlined_call_operand.vmem [shape: f32[2,8,32], index: 0, kind: input, shape index: {}]   ;;  %s2554_s1 = inlined_call_operand.vmem [shape: f32[8,32], index: 1, kind: input, shape index: {}]   ;;  %s2555_s2 = inlined_call_operand.vmem [shape: f32[8,32], index: 2, kind: input, shape index: {}]   ;;  %s2556_s3 = inlined_call_operand.vmem [shape: f32[8,32], index: 3, kind: input, shape index: {}]   ;;  %s2557_s4 = inlined_call_operand.hbm [shape: f32[8,16], index: 4, kind: input, shape index: {}]   ;;  %s2558_s5 = inlined_call_operand.vmem [shape: f32[8,16], index: 5, kind: input, shape index: {}]   ;;  %s2559_s6 = inlined_call_operand.hbm [shape: f32[8,16], index: 6, kind: input, shape index: {}]   ;;  %s2560_s7 = inlined_call_operand.vmem [shape: f32[1,32], index: 7, kind: input, shape index: {}]   ;;  %s2561_s8 = inlined_call_operand.vmem [shape: f32[1,32], index: 8, kind: input, shape index: {}]   ;;  %s2562_s9 = inlined_call_operand.vmem [shape: bf16[32,32], index: 9, kind: input, shape index: {}]   ;;  %s2563_s10 = inlined_call_operand.vmem [shape: bf16[32,16], index: 10, kind: input, shape index: {}]   ;;  %s2564_s11 = inlined_call_operand.vmem [shape: bf16[32,16], index: 11, kind: input, shape index: {}]   ;;  %s2565_s12 = inlined_call_operand.vmem [shape: bf16[32,32], index: 12, kind: input, shape index: {}]   ;;  %s2566_s13 = inlined_call_operand.vmem [shape: bf16[32,128], index: 13, kind: input, shape index: {}]   ;;  %s2567_s14 = inlined_call_operand.vmem [shape: bf16[32,128], index: 14, kind: input, shape index: {}]   ;;  %s2568_s15 = inlined_call_operand.vmem [shape: bf16[128,32], index: 15, kind: input, shape index: {}]   ;;  %s2569_s16 = inlined_call_operand.hbm [shape: f32[2,8,32], index: 16, kind: output, shape index: {}]  }
   0x1   :  { %2584 = sst [smem:[#allocation21_spill]] %s2553_s0 }
   0x2   :  { %2585 = sst [smem:[#allocation22_spill]] %s2569_s16 }
   0x3   :  { %21 = vsyncpa [#allocation5], 0 }
   0x4   :  { %22 = vsyncpa [#allocation8], 0 }
   0x5   :  { %23 = vsyncpa [#allocation6], 0 }
   0x6   :  { %25 = vsyncpa [#allocation6 + $0x1], 0  ;;  %s2191_s21 = smov 0   ;;  %s2193_s22 = smov 0  }
   0x7   :  { %s2195_s23 = smov 0   ;;  %s2197_s24 = smov 0  }
   0x8   :  { %s2199_s25 = smov 0   ;;  %s2201_s26 = smov 0  }
   0x9 LB: > { %2586 = sst [smem:[#allocation13_spill]] %s2068_s21  ;;  %s1632_s27 = sadd.s32 4294967295, %s2088_s26   ;;  %s2088_s26 = sphi %s2201_s26, %s31_s26   ;;  %s2084_s25 = sphi %s2199_s25, %s2612_s25   ;;  %s2080_s24 = sphi %s2197_s24, %s2611_s24   ;;  %s2076_s23 = sphi %s2195_s23, %s2610_s23   ;;  %s2072_s22 = sphi %s2193_s22, %s2614_s22   ;;  %s2068_s21 = sphi %s2191_s21, %s2613_s21  }
   0xa   : > { %2587 = sst [smem:[#allocation14_spill]] %s2076_s23  ;;  %s1633_s28 = sadd.s32 4294967294, %s2088_s26  }
   0xb   : > { %2588 = sst [smem:[#allocation15_spill]] %s2084_s25  ;;  %s43_s29 = sadd.s32 1, %s2084_s25 }
   0xc   : > { %2589 = sst [smem:[#allocation16_spill]] %s2088_s26  ;;  %s408_s30 = sadd.s32 1, %s2076_s23 }
   0xd   : > { %p45_p0 = scmp.ge.s32.totalorder %s43_s29, 2  ;;  %p418_p1 = scmp.ne.s32.totalorder %s2076_s23, %s2072_s22 }
   0xe   : > { %p419_p2 = scmp.eq.s32.totalorder %s1632_s27, 1  ;;  %p424_p3 = scmp.ne.s32.totalorder %s2072_s22, %s2068_s21 }
   0xf   : > { %s2616_s29 = smov (%p45_p0, %s43_s29), 0  ;;  %p425_p5 = scmp.eq.s32.totalorder %s1633_s28, 1 }
  0x10   : > { %2590 = sst [smem:[#allocation17_spill]] %s2616_s29  ;;  %p2231_p4 = por %p419_p2, %p418_p1 }
  0x11   : > { %s403_s17 = ssub.s32 %s2084_s25, %s2616_s29  ;;  %p1634_p6 = scmp.ge.s32.totalorder %s2088_s26, 1 }
  0x12   : > { %s2591_s0 = scalar_select %p2231_p4, 1, 0 }
  0x13   : > { %p406_p7 = scmp.eq.s32.totalorder %s403_s17, 0  ;;  %p2238_p8 = por %p425_p5, %p424_p3 }
  0x14   : > { %2592 = sst [smem:[#allocation18_spill]] %s2591_s0  ;;  %p432_p9 = scmp.lt.s32.totalorder %s2088_s26, 3 }
  0x15   : > { %s2593_s18 = scalar_select %p2238_p8, 1, 0 }
  0x16   : > { %s2244_s19 = scalar_select %p406_p7, %s2076_s23, %s408_s30  }
  0x17   : > { %2594 = sst [smem:[#allocation19_spill]] %s2593_s18  ;;  %p2246_p10 = pnand %p1634_p6, %p432_p9 }
  0x18   : > { %2595 = sst [smem:[#allocation20_spill]] %s2244_s19  ;;  %p2250_p11 = scmp.eq.s32.totalorder %s1632_s27, 0 }
  0x19   : > { %s2596_s20 = scalar_select %p2246_p10, 1, 0 }
  0x1a   : > { %s2597_s21 = scalar_select %p2250_p11, 1, 0 }
  0x1b   : > { %p1821_p12 = pneg %p2246_p10  ;;  %s2090_s28 = smov [#allocation4]  }
  0x1c   : > { %s466_s17 = sshll.u32 %s2090_s28, 4  ;;  %s2091_s29 = smov [#allocation7]   ;;  %s467_s17 = int_to_ptr.vmem [resolvable:$true] %s466_s17 }
  0x1d   : > { %s480_s25 = sshll.u32 %s2091_s29, 4  ;;  %p2258_p13 = pnand %p2250_p11, %p1821_p12  ;;  %s2262_s25 = int_to_ptr.vmem [resolvable:$true] %s480_s25 }
  0x1e   : > { %s1946_s23 = scalar_lea.hbm %s2557_s4, 128 }
  0x1f   : > { %p1947_p0 = scmp.ne.s32.totalorder %s2557_s4, %s1946_s23  ;;  %p1948_p1 = pneg %p2258_p13 }
  0x20   : > { %p1953_p5 = scmp.lt.u32.totalorder %s1946_s23, %s2557_s4 }
  0x21   : > { %p1949_p2 = pnand %p1948_p1, %p1947_p0 }
  0x23   : > { %p1950_p3 = pneg %p1949_p2 }
  0x25   : > { %p1955_p6 = pnand %p1953_p5, %p1950_p3 }
  0x27   : > { %1958 = shalt.err (!%p1955_p6)
}
  0x28   : > { %s1959_s16 = scalar_lea.vmem %s467_s17, 128  ;;  %p1967_p8 = scmp.lt.s32.totalorder %s467_s17, %s467_s17 }
  0x29   : > { %p1960_p7 = scmp.ne.s32.totalorder %s467_s17, %s1959_s16  ;;  %p1968_p4 = scmp.lt.s32.totalorder %s1959_s16, %s1959_s16 }
  0x2b   : > { %p1962_p9 = pnand %p1960_p7, %p1948_p1  ;;  %p1969_p11 = por %p1968_p4, %p1967_p8 }
  0x2d   : > { %p1963_p12 = pneg %p1962_p9 }
  0x2f   : > { %p1970_p10 = pnand %p1969_p11, %p1963_p12 }
  0x31   : > { %1973 = shalt.err (!%p1970_p10)
}
  0x32   : > { %1824 = dma.hbm_to_vmem [thread:$0]  (!%p2258_p13), %s2557_s4, 128, %s467_s17, [#allocation5]  }
  0x33   : > { %s1974_s27 = scalar_lea.hbm %s2559_s6, 128 }
  0x34   : > { %p1975_p0 = scmp.ne.s32.totalorder %s2559_s6, %s1974_s27  ;;  %p1981_p10 = scmp.lt.u32.totalorder %s1974_s27, %s2559_s6 }
  0x36   : > { %p1977_p4 = pnand %p1975_p0, %p1948_p1 }
  0x38   : > { %p1978_p8 = pneg %p1977_p4 }
  0x3a   : > { %p1983_p11 = pnand %p1981_p10, %p1978_p8 }
  0x3c   : > { %1986 = shalt.err (!%p1983_p11)
}
  0x3d   : > { %s1987_s17 = scalar_lea.vmem %s2262_s25, 128  ;;  %p1995_p6 = scmp.lt.s32.totalorder %s2262_s25, %s2262_s25 }
  0x3e   : > { %p1988_p2 = scmp.ne.s32.totalorder %s2262_s25, %s1987_s17  ;;  %p1996_p7 = scmp.lt.s32.totalorder %s1987_s17, %s1987_s17 }
  0x40   : > { %p1990_p3 = pnand %p1988_p2, %p1948_p1  ;;  %p1997_p9 = por %p1996_p7, %p1995_p6 }
  0x42   : > { %p1991_p5 = pneg %p1990_p3 }
  0x44   : > { %p1998_p12 = pnand %p1997_p9, %p1991_p5 }
  0x46   : > { %2001 = shalt.err (!%p1998_p12)
}
  0x47   : > { %1827 = dma.hbm_to_vmem [thread:$0]  (!%p2258_p13), %s2559_s6, 128, %s2262_s25, [#allocation8]  }
  0x48   : > { %p2599_p0 = scmp.ne.s32.totalorder %s2596_s20, 0 }
  0x49   : > { %p2600_p4 = scmp.ne.s32.totalorder (!%p2599_p0), %s2597_s21, 0 }
  0x4a   : > { %527 = sbr.rel (%p2599_p0) target bundleno = 2416 (0x970), region = 84 }
  0x51   : > { %2055 = dma.done.wait (%p2600_p4), [#allocation5], 128  }
  0x52   : > { %2057 = vsyncadd (%p2600_p4), [#allocation5], 4294967168 }
  0x53   : > { %2059 = dma.done.wait (%p2600_p4), [#allocation8], 128  }
  0x54   : > { %2061 = vsyncadd (%p2600_p4), [#allocation8], 4294967168  ;;  %p592_p1 = scmp.lt.s32.totalorder %s2080_s24, 1  ;;  %s2601_s23 = sld [smem:[#allocation21_spill]]  ;;  %vm616_vm0 = vcmask 261120   ;;  %v1900_v3 = vld [vmem:[%s2563_s10] sm:$0xff]  }
  0x55   : > { %v2092_v4 = vmov 0.0   ;;  %v1901_v5 = vld [vmem:[%s2563_s10 + $0x8] sm:$0xff]   ;;  %vm2093_vm1 = vmmov 0   ;;  %v1646_v13 = vld [vmem:[%s2560_s7] ss:$0 sm:$0xff]  ;;  %vm774_vm2 = vcmask 125952  }
  0x56   : > { %s593_s30 = scalar_select %p592_p1, %s2080_s24, 1  ;;  %1719 = vmatprep.subr.bf16.mxu1 %v2092_v4  ;;  %1749 = vmatprep.subr.bf16.mxu0 %v2092_v4  ;;  %v1902_v16 = vld [vmem:[%s2564_s11] sm:$0xff]   ;;  %v1903_v19 = vld [vmem:[%s2564_s11 + $0x8] sm:$0xff]   ;;  %vm870_vm3 = vcmask 228352   ;;  %vm769_vm4 = vcmask 31744   ;;  %vm759_vm5 = vcmask 97280  }
  0x57   : > { %1720 = vmatpush3.bf16.msra.mxu1 %v1900_v3  ;;  %1723 = vmatprep.mubr.msk.bf16.mxu1 %vm2093_vm1, %v2092_v4  ;;  %v1904_v21 = vld [vmem:[%s2562_s9] sm:$0xff]   ;;  %v1905_v23 = vld [vmem:[%s2562_s9 + $0x8] sm:$0xff]   ;;  %s2094_s21 = smov 100   ;;  %s2095_s27 = smov 124   ;;  %v750_v61 = vld [vmem:[#allocation7] sm:$0xff]  ;;  %vm904_vm6 = vcmask 64512  }
  0x58   : > { %s1645_s25 = sshll.u32 %s593_s30, 3  ;;  %1721 = vmatprep.subr.bf16.mxu1 %v2092_v4  ;;  %1751 = vmatprep.mubr.msk.bf16.mxu0 %vm2093_vm1, %v2092_v4  ;;  %s2096_s29 = smov 28   ;;  %v860_v39 = vld [vmem:[%s2555_s2] sm:$0xff]  ;;  %v748_v59 = vld [vmem:[#allocation4] sm:$0xff]  ;;  %vm891_vm7 = vcmask 1043456   ;;  %vm1168_vm9 = vcmask 130048  }
  0x59   : > { %s2097_s28 = smov 4   ;;  %s2098_s16 = smov 12   ;;  %v859_v41 = vld [vmem:[%s2554_s1] sm:$0xff]  ;;  %vm1170_vm10 = vcmask 195584  }
  0x5a   : > { %s595_s19 = scalar_lea.vmem %s2601_s23, %s1645_s25  ;;  %s2099_s17 = smov 116   ;;  %v861_v44 = vld [vmem:[%s2556_s3] sm:$0xff] }
  0x5b   : > { %v2326_v0 = vld [vmem:[%s595_s19] sm:$0xff]  ;;  %1722 = vmatpush3.bf16.msra.mxu1 %v1901_v5  ;;  %s2100_s23 = smov 120   ;;  %s2103_s26 = smov 16  }
  0x5c   : > { %v615_v1 = vmul.f32 %v2326_v0, %v2326_v0  ;;  %1727 = vmatprep.subr.bf16.mxu1 %v2092_v4  ;;  %v749_v56 = vld [vmem:[%s2558_s5] sm:$0xff]  ;;  %s2104_s30 = smov 24   ;;  %s1681_s18 = sshll.u32 %s2080_s24, 7 }
  0x5e   : > { %v617_v2 = vsel %vm616_vm0, %v615_v1, 0.0 }
  0x5f   : > { %618 = vadd.xlane.f32.xlu0 %v617_v2 }
  0x63   : > { %785 = vadd.xlane.f32.xlu0 %v617_v2 }
  0xec   : > { %v619_v6 = vpop.xlane.xlu0 %618 }
  0xed   : > { %v621_v7 = vmul.f32 0.03125, %v619_v6 }
  0xef   : > { %v622_v8 = vadd.f32 1e-05, %v621_v7 }
  0xf0   : > { %v786_v9 = vpop.xlane.xlu0 %785 }
  0xf1   : > { %1920 = vrsqrt.f32 %v622_v8  ;;  %v788_v10 = vmul.f32 0.03125, %v786_v9 }
  0xf3   : > { %v789_v11 = vadd.f32 1e-05, %v788_v10 }
  0xf5   : > { %1922 = vrsqrt.f32 %v789_v11 }
  0xfb   : > { %v1921_v12 = vpop.eup %1920 }
  0xfc   : > { %v624_v14 = vmul.f32 %v1921_v12, %v2326_v0 }
  0xfe   : > { %v631_v15 = vmul.f32 %v1646_v13, %v624_v14 }
  0xff   : > { %v1923_v18 = vpop.eup %1922 }
 0x100   : > { %v632_v17 = vpack.c.bf16 %v631_v15, %v631_v15  ;;  %v791_v20 = vmul.f32 %v1923_v18, %v2326_v0 }
 0x102   : > { %1724 = vmatmul.mubr.msk.bf16.vlgmr.msra.gmra.mrb[0].mxu1 %vm616_vm0, %v632_v17  ;;  %v798_v22 = vmul.f32 %v1646_v13, %v791_v20 }
 0x103   : > { %1728 = vmatpush3.bf16.msra.mxu1 %v1902_v16  ;;  %1731 = vmatprep.mubr.msk.bf16.mxu1 %vm2093_vm1, %v2092_v4  ;;  %v1002_v16 = vlaneseq }
 0x104   : > { %1729 = vmatprep.subr.bf16.mxu1 %v2092_v4  ;;  %v799_v24 = vpack.c.bf16 %v798_v22, %v798_v22 }
 0x105   : > { %v1005_v18 = vand.u32 127, %v1002_v16 }
 0x107   : > { %1730 = vmatpush3.bf16.msra.mxu1 %v1903_v19 }
 0x108   : > { %1735 = vmatprep.subr.bf16.mxu1 %v2092_v4 }
 0x10a   : > { %1732 = vmatmul.mubr.msk.bf16.vlgmr.msra.gmra.mrb[4].mxu1 %vm616_vm0, %v632_v17  ;;  %v1003_v17 = vshrl.u32 %v1002_v16, 7 }
 0x10b   : > { %1736 = vmatpush3.bf16.msra.mxu1 %v1904_v21  ;;  %1739 = vmatprep.mubr.msk.bf16.mxu1 %vm2093_vm1, %v2092_v4 }
 0x10c   : > { %1737 = vmatprep.subr.bf16.mxu1 %v2092_v4  ;;  %vm1008_vm8 = vcmp.gt.s32.totalorder %v1005_v18, %v1003_v17 }
 0x10f   : > { %1738 = vmatpush3.bf16.msra.mxu1 %v1905_v23 }
 0x110   : > { %1743 = vmatprep.subr.bf16.mxu1 %v2092_v4 }
 0x112   : > { %1740 = vmatmul.mubr.msk.bf16.vlgmr.msra.gmra.mrb[8].mxu1 %vm616_vm0, %v799_v24 }
 0x113   : > { %1745 = vmatprep.mubr.msk.bf16.mxu1 %vm2093_vm1, %v2092_v4 }
 0x1d5   : > { %v686_v25 = vpop.f32.mrb[0].mxu1 }
 0x1d6   : > { %v1725_v26 = vpop.f32.mrb[1].mxu1  ;;  %v751_v62 = vmul.f32 %v748_v59, %v686_v25 }
 0x1d7   : > { %v689_v27 = vpop.f32.mrb[2].mxu1 }
 0x1d8   : > { %v1726_v28 = vpop.f32.mrb[3].mxu1 }
 0x1dd   : > { %v742_v29 = vpop.f32.mrb[4].mxu1 }
 0x1de   : > { %v776_v30 = vpack.c.bf16 %v742_v29, %v742_v29  ;;  %v1733_v31 = vpop.f32.mrb[5].mxu1 }
 0x1df   : > { %v745_v32 = vpop.f32.mrb[6].mxu1 }
 0x1e0   : > { %777 = vst.msk [vmem:[#allocation3] sm:$0xf] %vm774_vm2, %v776_v30  ;;  %v1734_v33 = vpop.f32.mrb[7].mxu1 }
 0x1e5   : > { %v853_v34 = vpop.f32.mrb[8].mxu1 }
 0x1e6   : > { %874 = vrot.lane.b32.xlu0 %v853_v34, %s2094_s21  ;;  %864 = vrot.lane.b32.xlu1 %v853_v34, %s2095_s27  ;;  %v1741_v35 = vpop.f32.mrb[9].mxu1  ;;  %v862_v46 = vmul.f32 %v859_v41, %v853_v34 }
 0x1e7   : > { %v856_v36 = vpop.f32.mrb[10].mxu1  ;;  %v886_v9 = vld [vmem:[#allocation3] sm:$0xf] }
 0x1e8   : > { %v1742_v37 = vpop.f32.mrb[11].mxu1  ;;  %v1057_v12 = vsel %vm891_vm7, %v886_v9, 0 }
 0x1ea   : > { %867 = vrot.lane.b32.xlu1 %v853_v34, %s2096_s29 }
 0x1ee   : > { %877 = vrot.lane.b32.xlu1 %v853_v34, %s2097_s28 }
 0x1f2   : > { %753 = vrot.lane.b32.xlu1 %v686_v25, %s2095_s27  ;;  %s2101_s27 = smov 112  }
 0x1f6   : > { %756 = vrot.lane.b32.xlu1 %v686_v25, %s2098_s16  ;;  %s2102_s16 = smov 8  }
 0x1fa   : > { %763 = vrot.lane.b32.xlu1 %v686_v25, %s2099_s17 }
 0x1fe   : > { %766 = vrot.lane.b32.xlu1 %v686_v25, %s2097_s28 }
 0x258   : > { %v865_v38 = vpop.permute.xlu1 %864  ;;  %v875_v45 = vpop.permute.xlu0 %874 }
 0x25c   : > { %v868_v40 = vpop.permute.xlu1 %867 }
 0x25d   : > { %v871_v42 = vsel %vm870_vm3, %v865_v38, %v868_v40 }
 0x25e   : > { %v872_v43 = vmul.f32 %v871_v42, %v860_v39 }
 0x260   : > { %v878_v47 = vpop.permute.xlu1 %877  ;;  %v873_v49 = vadd.f32 %v872_v43, %v862_v46 }
 0x261   : > { %v881_v48 = vsel %vm769_vm4, %v875_v45, %v878_v47 }
 0x262   : > { %v882_v50 = vmul.f32 %v881_v48, %v861_v44 }
 0x264   : > { %v883_v51 = vadd.f32 %v882_v50, %v873_v49  ;;  %v754_v52 = vpop.permute.xlu1 %753 }
 0x266   : > { %v884_v53 = vpack.c.bf16 %v883_v51, %v883_v51 }
 0x268   : > { %v757_v54 = vpop.permute.xlu1 %756  ;;  %v888_v55 = vrot.slane %v884_v53, 4 }
 0x269   : > { %v760_v57 = vsel %vm759_vm5, %v754_v52, %v757_v54 }
 0x26a   : > { %889 = vrot.lane.b32.xlu1 %v888_v55, %s2100_s23  ;;  %v761_v60 = vmul.f32 %v760_v57, %v749_v56 }
 0x26c   : > { %v764_v58 = vpop.permute.xlu1 %763  ;;  %v762_v2 = vadd.f32 %v761_v60, %v751_v62 }
 0x270   : > { %v767_v63 = vpop.permute.xlu1 %766 }
 0x271   : > { %v770_v1 = vsel %vm769_vm4, %v764_v58, %v767_v63 }
 0x272   : > { %v771_v3 = vmul.f32 %v770_v1, %v750_v61  ;;  %v1906_v1 = vld [vmem:[%s2565_s12] sm:$0xff]  }
 0x274   : > { %v772_v5 = vadd.f32 %v771_v3, %v762_v2 }
 0x276   : > { %v773_v6 = vpack.c.bf16 %v772_v5, %v772_v5 }
 0x278   : > { %775 = vst.msk [vmem:[#allocation2] sm:$0xf] %vm774_vm2, %v773_v6 }
 0x27f   : > { %v885_v7 = vld [vmem:[#allocation2] sm:$0xf] }
 0x280   : > { %899 = vrot.lane.b32.xlu0 %v885_v7, %s2100_s23  ;;  %v908_v8 = vsel %vm904_vm6, %v885_v7, 0 }
 0x281   : > { %1744 = vmatpush3.bf16.xpose.msra.mxu1 %v908_v8 }
 0x282   : > { %1755 = vmatprep.subr.bf16.mxu1 %v2092_v4 }
 0x2dc   : > { %v890_v10 = vpop.permute.xlu1 %889 }
 0x2dd   : > { %v894_v11 = vsel %vm891_vm7, %v884_v53, %v890_v10  ;;  %v1907_v10 = vld [vmem:[%s2565_s12 + $0x8] sm:$0xff]  }
 0x2de   : > { %896 = vrot.lane.b32.xlu1 %v894_v11, %s2101_s27  ;;  %1746 = vmatmul.mubr.msk.bf16.vlgmr.msra.gmra.mrb[12].mxu1 %vm904_vm6, %v894_v11  ;;  %s2603_s27 = sld [smem:[#allocation22_spill]] }
 0x2df   : > { %1756 = vmatpush3.bf16.msra.mxu1 %v1057_v12  ;;  %1757 = vmatprep.mubr.msk.bf16.mxu1 %vm2093_vm1, %v2092_v4 }
 0x2e0   : > { %1767 = vmatprep.subr.bf16.mxu1 %v2092_v4 }
 0x2e4   : > { %s2505_s29 = scalar_lea.hbm %s2603_s27, %s1681_s18 }
 0x2f2   : > { %v900_v13 = vpop.permute.xlu0 %899 }
 0x2f3   : > { %v955_v14 = vsel %vm904_vm6, %v900_v13, 0 }
 0x2f4   : > { %1750 = vmatpush3.bf16.xpose.msra.mxu0 %v955_v14 }
 0x2f5   : > { %1761 = vmatprep.subr.bf16.mxu0 %v2092_v4 }
 0x350   : > { %v897_v15 = vpop.permute.xlu1 %896 }
 0x351   : > { %1752 = vmatmul.mubr.msk.bf16.vlgmr.msra.gmra.mrb[0].mxu0 %vm904_vm6, %v897_v15 }
 0x352   : > { %1763 = vmatprep.mubr.msk.bf16.mxu0 %vm2093_vm1, %v2092_v4 }
 0x3b1   : > { %v944_v19 = vpop.f32.mrb[12].mxu1 }
 0x3b2   : > { %v998_v20 = vmul.f32 0.35355338, %v944_v19  ;;  %v1747_v21 = vpop.f32.mrb[13].mxu1 }
 0x3b3   : > { %v947_v22 = vpop.f32.mrb[14].mxu1 }
 0x3b4   : > { %v999_v23 = vmul.f32 0.35355338, %v947_v22  ;;  %v1748_v24 = vpop.f32.mrb[15].mxu1  ;;  %v1011_v25 = vsel %vm1008_vm8, -inf, %v998_v20 }
 0x3b5   : > { %v1015_v26 = vsel %vm904_vm6, %v1011_v25, -inf }
 0x3b6   : > { %1016 = vmax.xlane.f32.xlu0 %v1015_v26  ;;  %v1012_v27 = vsel %vm1008_vm8, -inf, %v999_v23 }
 0x3b7   : > { %v1018_v28 = vsel %vm904_vm6, %v1012_v27, -inf }
 0x3b8   : > { %1019 = vmax.xlane.f32.xlu1 %v1018_v28 }
 0x3c9   : > { %902 = vrot.lane.b32.xlu1 %v886_v9, %s2100_s23 }
 0x424   : > { %v991_v29 = vpop.f32.mrb[0].mxu0 }
 0x425   : > { %v1000_v30 = vmul.f32 0.35355338, %v991_v29  ;;  %v1753_v31 = vpop.f32.mrb[1].mxu0 }
 0x426   : > { %v994_v32 = vpop.f32.mrb[2].mxu0 }
 0x427   : > { %v1001_v33 = vmul.f32 0.35355338, %v994_v32  ;;  %v1754_v34 = vpop.f32.mrb[3].mxu0  ;;  %v1013_v35 = vsel %vm1008_vm8, -inf, %v1000_v30 }
 0x428   : > { %v1021_v36 = vsel %vm904_vm6, %v1013_v35, -inf }
 0x429   : > { %1022 = vmax.xlane.f32.xlu0 %v1021_v36  ;;  %v1014_v37 = vsel %vm1008_vm8, -inf, %v1001_v33 }
 0x42a   : > { %v1024_v38 = vsel %vm904_vm6, %v1014_v37, -inf }
 0x42d   : > { %1025 = vmax.xlane.f32.xlu0 %v1024_v38  ;;  %v1909_v38 = vld [vmem:[%s2567_s14] sm:$0xff]  }
 0x443   : > { %v1017_v39 = vpop.xlane.xlu0 %1016 }
 0x444   : > { %v1027_v40 = vsub.f32 %v1011_v25, %v1017_v39  ;;  %v1911_v39 = vld [vmem:[%s2567_s14 + $0x8] sm:$0xff]  }
 0x445   : > { %v1020_v41 = vpop.xlane.xlu1 %1019 }
 0x446   : > { %v1031_v42 = vmul.f32 1.442695, %v1027_v40  ;;  %v1028_v43 = vsub.f32 %v1012_v27, %v1020_v41 }
 0x448   : > { %v1033_v44 = vmul.f32 1.442695, %v1028_v43  ;;  %1924 = vpow2.f32 %v1031_v42 }
 0x449   : > { %v903_v45 = vpop.permute.xlu1 %902 }
 0x44a   : > { %1926 = vpow2.f32 %v1033_v44  ;;  %v1104_v46 = vsel %vm891_vm7, %v903_v45, 0  ;;  %v1664_v44 = vld [vmem:[%s2561_s8] ss:$0 sm:$0xff] }
 0x44b   : > { %1762 = vmatpush3.bf16.msra.mxu0 %v1104_v46 }
 0x44c   : > { %1775 = vmatprep.subr.bf16.mxu0 %v2092_v4 }
 0x452   : > { %v1925_v47 = vpop.eup %1924 }
 0x453   : > { %v1039_v62 = vsel %vm904_vm6, %v1925_v47, 0.0 }
 0x454   : > { %v1927_v48 = vpop.eup %1926 }
 0x455   : > { %v1042_v49 = vsel %vm904_vm6, %v1927_v48, 0.0  ;;  %v1051_v50 = vpack.c.bf16 %v1927_v48, %v1925_v47  ;;  %v1912_v48 = vld [vmem:[%s2568_s15] sm:$0xff]  }
 0x456   : > { %1043 = vadd.xlane.f32.xlu0 %v1042_v49  ;;  %v1913_v49 = vld [vmem:[%s2568_s15 + $0x8] sm:$0xff]  }
 0x457   : > { %1758 = vmatmul.mubr.msk.bf16.vlgmr.msra.gmra.mrb[16].mxu1 %vm904_vm6, %v1051_v50  ;;  %v1914_v50 = vld [vmem:[%s2568_s15 + $0x10] sm:$0xff]  }
 0x458   : > { %1771 = vmatprep.mubr.msk.bf16.mxu1 %vm2093_vm1, %v2092_v4  ;;  %1768 = vmatpush3.bf16.msra.mxu1 %v1906_v1 }
 0x459   : > { %1769 = vmatprep.subr.bf16.mxu1 %v2092_v4 }
 0x45c   : > { %1770 = vmatpush3.bf16.msra.mxu1 %v1907_v10 }
 0x45d   : > { %1783 = vmatprep.subr.bf16.mxu1 %v2092_v4 }
 0x4b6   : > { %v1023_v51 = vpop.xlane.xlu0 %1022 }
 0x4b7   : > { %v1029_v52 = vsub.f32 %v1013_v35, %v1023_v51  ;;  %v1915_v51 = vld [vmem:[%s2568_s15 + $0x18] sm:$0xff]  }
 0x4b9   : > { %v1035_v53 = vmul.f32 1.442695, %v1029_v52  ;;  %v1916_v52 = vld [vmem:[%s2568_s15 + $0x20] sm:$0xff]  }
 0x4ba   : > { %v1026_v54 = vpop.xlane.xlu0 %1025 }
 0x4bb   : > { %1928 = vpow2.f32 %v1035_v53  ;;  %v1030_v55 = vsub.f32 %v1014_v37, %v1026_v54  ;;  %v1908_v37 = vld [vmem:[%s2566_s13] sm:$0xff]   ;;  %v1917_v53 = vld [vmem:[%s2568_s15 + $0x28] sm:$0xff]   ;;  %v1918_v54 = vld [vmem:[%s2568_s15 + $0x30] sm:$0xff]  }
 0x4bd   : > { %v1037_v56 = vmul.f32 1.442695, %v1030_v55  ;;  %v1919_v55 = vld [vmem:[%s2568_s15 + $0x38] sm:$0xff]  }
 0x4bf   : > { %1930 = vpow2.f32 %v1037_v56 }
 0x4c5   : > { %v1929_v57 = vpop.eup %1928 }
 0x4c6   : > { %v1045_v58 = vsel %vm904_vm6, %v1929_v57, 0.0 }
 0x4c7   : > { %1046 = vadd.xlane.f32.xlu0 %v1045_v58 }
 0x4c9   : > { %v1931_v59 = vpop.eup %1930 }
 0x4ca   : > { %v1048_v60 = vsel %vm904_vm6, %v1931_v59, 0.0  ;;  %v1052_v61 = vpack.c.bf16 %v1931_v59, %v1929_v57 }
 0x4cb   : > { %1049 = vadd.xlane.f32.xlu0 %v1048_v60 }
 0x4cc   : > { %1764 = vmatmul.mubr.msk.bf16.vlgmr.msra.gmra.mrb[4].mxu0 %vm904_vm6, %v1052_v61 }
 0x4cd   : > { %1779 = vmatprep.mubr.msk.bf16.mxu0 %vm2093_vm1, %v2092_v4  ;;  %1776 = vmatpush3.bf16.msra.mxu0 %v1908_v37 }
 0x4ce   : > { %1777 = vmatprep.subr.bf16.mxu0 %v2092_v4 }
 0x4cf   : > { %1040 = vadd.xlane.f32.xlu0 %v1039_v62 }
 0x4e3   : > { %v1044_v63 = vpop.xlane.xlu0 %1043 }
 0x4e4   : > { %1932 = vrcp.f32 %v1044_v63 }
 0x4ee   : > { %v1933_v5 = vpop.eup %1932 }
 0x52a   : > { %v1093_v2 = vpop.f32.mrb[16].mxu1 }
 0x52b   : > { %v1759_v3 = vpop.f32.mrb[17].mxu1 }
 0x52c   : > { %v1096_v6 = vpop.f32.mrb[18].mxu1 }
 0x52d   : > { %v1152_v7 = vmul.f32 %v1933_v5, %v1096_v6  ;;  %v1760_v8 = vpop.f32.mrb[19].mxu1 }
 0x52f   : > { %1156 = vrot.lane.b32.xlu0 %v1152_v7, %s2102_s16  ;;  %s2105_s16 = smov [#allocation9]  }
 0x530   : > { %s2006_s17 = sshll.u32 %s2105_s16, 4  ;;  %s2007_s17 = int_to_ptr.vmem [resolvable:$false] %s2006_s17 }
 0x531   : > { %s2008_s0 = scalar_lea.vmem %s2007_s17, 256 }
 0x554   : > { %v1047_v9 = vpop.xlane.xlu0 %1046 }
 0x555   : > { %1934 = vrcp.f32 %v1047_v9 }
 0x558   : > { %v1050_v11 = vpop.xlane.xlu0 %1049 }
 0x559   : > { %1936 = vrcp.f32 %v1050_v11 }
 0x55c   : > { %v1041_v20 = vpop.xlane.xlu0 %1040 }
 0x55d   : > { %1938 = vrcp.f32 %v1041_v20 }
 0x55f   : > { %v1935_v12 = vpop.eup %1934 }
 0x563   : > { %v1937_v18 = vpop.eup %1936 }
 0x567   : > { %v1939_v21 = vpop.eup %1938 }
 0x568   : > { %v1151_v24 = vmul.f32 %v1939_v21, %v1093_v2 }
 0x59f   : > { %v1140_v13 = vpop.f32.mrb[4].mxu0 }
 0x5a0   : > { %v1153_v14 = vmul.f32 %v1935_v12, %v1140_v13  ;;  %v1765_v15 = vpop.f32.mrb[5].mxu0 }
 0x5a1   : > { %v1143_v16 = vpop.f32.mrb[6].mxu0  ;;  %v1157_v22 = vpop.permute.xlu0 %1156 }
 0x5a2   : > { %1160 = vrot.lane.b32.xlu1 %v1153_v14, %s2103_s26  ;;  %v1766_v17 = vpop.f32.mrb[7].mxu0  ;;  %v1154_v19 = vmul.f32 %v1937_v18, %v1143_v16  ;;  %v1167_v25 = vsel %vm904_vm6, %v1151_v24, %v1157_v22  ;;  %s589_s26 = sand.u32 1, %s2072_s22  }
 0x5a3   : > { %s1644_s25 = sshll.u32 %s589_s26, 3  ;;  %s1481_s24 = scalar_lea.sflag [#allocation6], %s589_s26 }
 0x5a4   : > { %s591_s20 = scalar_lea.vmem [#allocation9], %s1644_s25 }
 0x5a5   : > { %s1495_s23 = sshll.u32 %s591_s20, 4  ;;  %s2507_s23 = int_to_ptr.vmem [resolvable:$true] %s1495_s23 }
 0x5a6   : > { %1164 = vrot.lane.b32.xlu1 %v1154_v19, %s2104_s30  ;;  %s2602_s30 = sld [smem:[#allocation18_spill]]  ;;  %s2002_s28 = scalar_lea.vmem %s2507_s23, 128 }
 0x5a7   : > { %p2003_p13 = scmp.ne.s32.totalorder %s2507_s23, %s2002_s28  ;;  %p2009_p2 = scmp.lt.s32.totalorder %s2507_s23, %s2007_s17 }
 0x5a8   : > { %p2010_p3 = scmp.lt.s32.totalorder %s2008_s0, %s2002_s28 }
 0x5aa   : > { %p2011_p5 = por %p2010_p3, %p2009_p2 }
 0x5ac   : > { %p2604_p8 = scmp.ne.s32.totalorder %s2602_s30, 0 }
 0x5ae   : > { %p2004_p10 = pnand %p2003_p13, %p2604_p8 }
 0x5b0   : > { %p2005_p11 = pneg %p2004_p10 }
 0x5b2   : > { %p2012_p6 = pnand %p2011_p5, %p2005_p11 }
 0x614   : > { %v1161_v23 = vpop.permute.xlu1 %1160 }
 0x615   : > { %v1169_v26 = vsel %vm1168_vm9, %v1167_v25, %v1161_v23 }
 0x618   : > { %v1165_v27 = vpop.permute.xlu1 %1164 }
 0x619   : > { %v1171_v28 = vsel %vm1170_vm10, %v1169_v26, %v1165_v27 }
 0x61a   : > { %v1172_v29 = vpack.c.bf16 %v1171_v28, %v1171_v28 }
 0x61c   : > { %1772 = vmatmul.mubr.msk.bf16.vlgmr.msra.gmra.mrb[20].mxu1 %vm616_vm0, %v1172_v29 }
 0x61d   : > { %1787 = vmatprep.mubr.msk.bf16.mxu1 %vm2093_vm1, %v2092_v4  ;;  %1784 = vmatpush3.bf16.msra.mxu1 %v1909_v38 }
 0x61e   : > { %1785 = vmatprep.subr.bf16.mxu1 %v2092_v4 }
 0x621   : > { %1786 = vmatpush3.bf16.msra.mxu1 %v1911_v39 }
 0x6ef   : > { %v1226_v30 = vpop.f32.mrb[20].mxu1 }
 0x6f0   : > { %v2440_v31 = vadd.f32 %v1226_v30, %v2326_v0  ;;  %v1773_v32 = vpop.f32.mrb[21].mxu1  ;;  %v1910_v0 = vld [vmem:[%s2566_s13 + $0x8] sm:$0xff]  }
 0x6f1   : > { %v1229_v33 = vpop.f32.mrb[22].mxu1  ;;  %1778 = vmatpush3.bf16.msra.mxu0 %v1910_v0 }
 0x6f2   : > { %v1774_v34 = vpop.f32.mrb[23].mxu1  ;;  %v1234_v35 = vmul.f32 %v2440_v31, %v2440_v31  ;;  %1791 = vmatprep.subr.bf16.mxu0 %v2092_v4 }
 0x6f4   : > { %v1235_v36 = vsel %vm616_vm0, %v1234_v35, 0.0 }
 0x6f5   : > { %1236 = vadd.xlane.f32.xlu1 %v1235_v36 }
 0x782   : > { %v1237_v40 = vpop.xlane.xlu1 %1236 }
 0x783   : > { %v1238_v41 = vmul.f32 0.03125, %v1237_v40 }
 0x785   : > { %v1239_v42 = vadd.f32 1e-05, %v1238_v41 }
 0x787   : > { %1940 = vrsqrt.f32 %v1239_v42 }
 0x791   : > { %v1941_v43 = vpop.eup %1940 }
 0x792   : > { %v1241_v45 = vmul.f32 %v1941_v43, %v2440_v31 }
 0x794   : > { %v1248_v46 = vmul.f32 %v1664_v44, %v1241_v45 }
 0x796   : > { %v1249_v47 = vpack.c.bf16 %v1248_v46, %v1248_v46 }
 0x798   : > { %1780 = vmatmul.mubr.msk.bf16.vlgmr.msra.gmra.mrb[8].mxu0 %vm616_vm0, %v1249_v47  ;;  %1788 = vmatmul.mubr.msk.bf16.vlgmr.msra.gmra.mrb[24].mxu1 %vm616_vm0, %v1249_v47 }
 0x799   : > { %1807 = vmatprep.mubr.msk.bf16.mxu0 %vm2093_vm1, %v2092_v4  ;;  %1792 = vmatpush3.bf16.msra.mxu0 %v1912_v48 }
 0x79a   : > { %1793 = vmatprep.subr.bf16.mxu0 %v2092_v4 }
 0x79d   : > { %1794 = vmatpush3.bf16.msra.mxu0 %v1913_v49 }
 0x79e   : > { %1795 = vmatprep.subr.bf16.mxu0 %v2092_v4 }
 0x7a1   : > { %1796 = vmatpush3.bf16.msra.mxu0 %v1914_v50 }
 0x7a2   : > { %1797 = vmatprep.subr.bf16.mxu0 %v2092_v4 }
 0x7a5   : > { %1798 = vmatpush3.bf16.msra.mxu0 %v1915_v51 }
 0x7a6   : > { %1799 = vmatprep.subr.bf16.mxu0 %v2092_v4 }
 0x7a9   : > { %1800 = vmatpush3.bf16.msra.mxu0 %v1916_v52 }
 0x7aa   : > { %1801 = vmatprep.subr.bf16.mxu0 %v2092_v4 }
 0x7ad   : > { %1802 = vmatpush3.bf16.msra.mxu0 %v1917_v53 }
 0x7ae   : > { %1803 = vmatprep.subr.bf16.mxu0 %v2092_v4 }
 0x7b1   : > { %1804 = vmatpush3.bf16.msra.mxu0 %v1918_v54 }
 0x7b2   : > { %1805 = vmatprep.subr.bf16.mxu0 %v2092_v4 }
 0x7b5   : > { %1806 = vmatpush3.bf16.msra.mxu0 %v1919_v55 }
 0x86b   : > { %v1303_v56 = vpop.f32.mrb[8].mxu0  ;;  %v1359_v57 = vpop.f32.mrb[24].mxu1 }
 0x86c   : > { %v1671_v58 = vmul.f32 -1.442695, %v1303_v56  ;;  %v1781_v59 = vpop.f32.mrb[9].mxu0  ;;  %v1789_v60 = vpop.f32.mrb[25].mxu1 }
 0x86d   : > { %v1306_v61 = vpop.f32.mrb[10].mxu0  ;;  %v1362_v62 = vpop.f32.mrb[26].mxu1 }
 0x86e   : > { %1942 = vpow2.f32 %v1671_v58  ;;  %v1782_v63 = vpop.f32.mrb[11].mxu0  ;;  %v1790_v1 = vpop.f32.mrb[27].mxu1 }
 0x878   : > { %v1943_v2 = vpop.eup %1942 }
 0x879   : > { %v1368_v3 = vadd.f32 1.0, %v1943_v2 }
 0x87b   : > { %1944 = vrcp.f32 %v1368_v3 }
 0x885   : > { %v1945_v4 = vpop.eup %1944 }
 0x886   : > { %v1371_v5 = vmul.f32 %v1945_v4, %v1303_v56 }
 0x888   : > { %v1372_v6 = vmul.f32 %v1371_v5, %v1359_v57 }
 0x88a   : > { %v1373_v7 = vpack.c.bf16 %v1372_v6, %v1372_v6 }
 0x88c   : > { %1808 = vmatmul.mubr.bf16.vlgmr.msra.gmra.mrb[12].mxu0 %v1373_v7 }
 0x95f   : > { %v1472_v8 = vpop.f32.mrb[12].mxu0 }
 0x960   : > { %v1478_v9 = vadd.f32 %v1472_v8, %v2440_v31  ;;  %v1809_v10 = vpop.f32.mrb[13].mxu0 }
 0x961   : > { %v1475_v11 = vpop.f32.mrb[14].mxu0 }
 0x962   : > { %v1810_v12 = vpop.f32.mrb[15].mxu0  ;;  %1479 = vst.msk [vmem:[%s591_s20] sm:$0xff] %vm616_vm0, %v1478_v9 }
 0x963   : > { %2015 = shalt.err (!%p2012_p6)
}
 0x964   : > { %s2016_s26 = scalar_lea.hbm %s2505_s29, 128  ;;  %s2020_s20 = scalar_lea.hbm %s2603_s27, 256 }
 0x965   : > { %p2017_p7 = scmp.ne.s32.totalorder %s2505_s29, %s2016_s26  ;;  %p2021_p0 = scmp.lt.u32.totalorder %s2505_s29, %s2603_s27 }
 0x966   : > { %p2022_p4 = scmp.lt.u32.totalorder %s2020_s20, %s2016_s26  ;;  %p2024_p13 = scmp.lt.u32.totalorder %s2016_s26, %s2505_s29 }
 0x967   : > { %p2018_p9 = pnand %p2017_p7, %p2604_p8 }
 0x968   : > { %p2023_p1 = por %p2022_p4, %p2021_p0 }
 0x969   : > { %p2019_p12 = pneg %p2018_p9 }
 0x96a   : > { %p2025_p10 = por %p2024_p13, %p2023_p1 }
 0x96c   : > { %p2026_p11 = pnand %p2025_p10, %p2019_p12 }
 0x96e   : > { %2029 = shalt.err (!%p2026_p11)
}
 0x96f   : > { %1819 = dma.vmem_to_hbm [thread:$0]  (%p2604_p8), %s2507_s23, 128, %s2505_s29, %s1481_s24  }
 0x970 PF: > { %s2605_s28 = sld [smem:[#allocation16_spill]]  ;;  %s2606_s16 = sld [smem:[#allocation13_spill]] }
 0x971   : > { %s2607_s17 = sld [smem:[#allocation19_spill]] }
 0x976   : > { %p1836_p2 = scmp.ge.s32.totalorder %s2605_s28, 2  ;;  %s1507_s0 = sand.u32 1, %s2606_s16  }
 0x977   : > { %p2608_p3 = scmp.ne.s32.totalorder %s2607_s17, 0  ;;  %s1508_s25 = scalar_lea.sflag [#allocation6], %s1507_s0 }
 0x979   : > { %p1829_p5 = pnand %p1836_p2, %p2608_p3 }
 0x97b   : > { %2063 = dma.done.wait (!%p1829_p5), %s1508_s25, 128  }
 0x97c   : > { %2065 = vsyncadd (!%p1829_p5), %s1508_s25, 4294967168  ;;  %s31_s26 = sadd.s32 1, %s2605_s28   ;;  %s2609_s18 = sld [smem:[#allocation14_spill]] }
 0x97d   : > { %p28_p6 = scmp.ge.s32.totalorder %s31_s26, 4   ;;  %s2610_s23 = sld [smem:[#allocation20_spill]] }
 0x97e   : > { %s2611_s24 = sld [smem:[#allocation15_spill]]  ;;  %s2612_s25 = sld [smem:[#allocation17_spill]] }
 0x97f   : > { %s2613_s21 = smov %s2072_s22  ;;  %30 = sbr.rel (!%p28_p6) target bundleno = 9 (0x9), region = 142 }
 0x982   : > { %s2614_s22 = smov %s2609_s18 }
 0x986   :  { %1513 = vsyncpa [#allocation5], 1 }
 0x987   :  { %1515 = vsyncpa [#allocation5 + $0x1], 1 }
 0x988   :  { %1516 = vsyncpa [#allocation8], 1 }
 0x989   :  { %1517 = vsyncpa [#allocation6], 1 }
 0x98a   :  { %1519 = vsyncpa [#allocation6 + $0x1], 1 }

</bundles_post_ra>
